<compile_context>
chip_gen: v5e
topology: v5e:2x2
jax: 0.10.0
libtpu: 0.0.40
codegen_flags: <defaults>
</compile_context>

<pallas_src>
import functools

import numpy as np

import jax
import jax.numpy as jnp
from jax.experimental import pallas as pl
from jax.experimental.pallas import tpu as pltpu


DILATIONS = (3, 5, 7)


# ----------------------------------------------------------------------------
# Fused Pallas kernel (one batch element per grid step)
# ----------------------------------------------------------------------------
def _dcspm_fused_kernel(x_ref, xg_ref, mask_ref, cv1w_ref, cv1b_ref,
                        m1w_ref, m1b_ref, m2w_ref, m2b_ref, cw_ref, cb_ref,
                        o_ref, *, w, dilations):
    f32 = jnp.float32
    hw = x_ref.shape[-1]
    c = cv1w_ref.shape[0] // 2

    def mxu(a, b):
        # bf16 MXU matmul with f32 accumulation (weights are already bf16).
        return jnp.dot(a.astype(jnp.bfloat16), b.astype(jnp.bfloat16),
                       preferred_element_type=f32)

    x_bf = x_ref[0]                                              # (c1, hw) bf16

    # cv1: 1x1 conv (BN scale folded into the weight rows) + shift + ReLU.
    y = jnp.maximum(mxu(cv1w_ref[...], x_bf) + cv1b_ref[...], 0.0)  # (2c, hw)
    y0 = y[:c]
    y1 = y[c:]

    # Chained bottlenecks: 1x1 conv -> dilated 3x3 conv (dilation 3 / 5 / 7).
    cur = y1
    branch = []
    for i, d in enumerate(dilations):
        # Bottleneck cv1 (hidden width zero-padded to a full sublane tile).
        t = jnp.maximum(mxu(m1w_ref[i], cur) + m1b_ref[i], 0.0)  # (c_pad, hw)

        # Dilated 3x3 "same" conv as 9 rolled+masked taps, each one MXU matmul
        # into a lane-dense (c, hw) f32 accumulator (2 vregs).
        acc = jnp.zeros((c, hw), f32)
        for ky in range(3):
            for kx in range(3):
                tap_idx = i * 9 + ky * 3 + kx
                shift = (-((ky - 1) * d * w + (kx - 1) * d)) % hw
                if ky == 1 and kx == 1:
                    tap = t                                     # centre tap
                else:
                    tap = pltpu.roll(t, shift, 1) * mask_ref[tap_idx]
                acc = acc + mxu(m2w_ref[tap_idx], tap)
        cur = jnp.maximum(acc + m2b_ref[i], 0.0)                # (c, hw)
        branch.append(cur)

    # Final 1x1 conv over cat([y1, m0, m1, m2, y0, x_grad]) + bias + x, ReLU.
    # The concat is of 8-sublane-aligned tiles inside VMEM — never hits HBM.
    cat = jnp.concatenate(
        [y1, branch[0], branch[1], branch[2], y0, xg_ref[0].astype(f32)],
        axis=0)                                                  # (6c, hw)
    res = mxu(cw_ref[...], cat) + cb_ref[...] + x_bf.astype(f32)
    o_ref[0] = jnp.maximum(res, 0.0)


# ----------------------------------------------------------------------------
# Host-side helpers
# ----------------------------------------------------------------------------
def _build_tap_masks(h, w, dilations):
    """0/1 halo-validity masks for every (dilation, ky, kx) tap, over H*W."""
    yy, xx = np.meshgrid(np.arange(h), np.arange(w), indexing="ij")
    yy = yy.reshape(-1)
    xx = xx.reshape(-1)
    masks = np.zeros((len(dilations) * 9, 1, h * w), np.float32)
    for i, d in enumerate(dilations):
        for ky in range(3):
            for kx in range(3):
                dy, dx = (ky - 1) * d, (kx - 1) * d
                ok = ((yy + dy >= 0) & (yy + dy < h) &
                      (xx + dx >= 0) & (xx + dx < w))
                masks[i * 9 + ky * 3 + kx, 0] = ok
    return jnp.asarray(masks)


def init_dcspm_params(key, c1, c2):
    """Synthetic DCSPM parameters with inference BatchNorm folded in.

    Conv weights are stored MXU-ready as (c_out, c_in) [per 3x3 tap] bf16
    matrices with the BN scale (gamma / sqrt(var + eps)) folded into the rows;
    the BN shift (beta - mean * scale) is an f32 (c_out, 1) column that
    broadcasts over the lane (spatial) dimension.  The bottleneck hidden width
    c_ = c // 4 is zero-padded to a full 8-sublane tile (results unchanged).
    """
    c = int(c2 * 0.25)
    c_ = int(c * 0.25)
    c_pad = max(8, ((c_ + 7) // 8) * 8)

    def bn_fold(k, ch):
        k1, k2, k3, k4 = jax.random.split(k, 4)
        gamma = jax.random.uniform(k1, (ch,), jnp.float32, 0.5, 1.5)
        beta = 0.1 * jax.random.normal(k2, (ch,), jnp.float32)
        mean = 0.1 * jax.random.normal(k3, (ch,), jnp.float32)
        var = jax.random.uniform(k4, (ch,), jnp.float32, 0.5, 1.5)
        scale = gamma / jnp.sqrt(var + 1e-5)          # BatchNorm2d eps default
        return scale, beta - mean * scale

    keys = iter(jax.random.split(key, 20))
    params = {}

    # cv1: Conv(c1 -> 2c, 1x1, bias=False) + BN + ReLU
    wmat = 0.1 * jax.random.normal(next(keys), (2 * c, c1), jnp.float32)
    s, b = bn_fold(next(keys), 2 * c)
    params["cv1_w"] = (wmat * s[:, None]).astype(jnp.bfloat16)
    params["cv1_b"] = b.reshape(2 * c, 1)

    m1_w, m1_b, m2_w, m2_b = [], [], [], []
    for _ in DILATIONS:
        # Bottleneck.cv1: Conv(c -> c_, 1x1) + BN + ReLU (padded to c_pad rows)
        wmat = 0.1 * jax.random.normal(next(keys), (c_, c), jnp.float32)
        s, b = bn_fold(next(keys), c_)
        wp = jnp.zeros((c_pad, c), jnp.float32).at[:c_].set(wmat * s[:, None])
        bp = jnp.zeros((c_pad, 1), jnp.float32).at[:c_].set(b[:, None])
        m1_w.append(wp)
        m1_b.append(bp)

        # Bottleneck.cv2: Conv(c_ -> c, 3x3, dilation d) + BN + ReLU,
        # stored per tap as 9 (c, c_pad) matrices (tap index = ky*3 + kx).
        wk = 0.1 * jax.random.normal(next(keys), (c, c_, 3, 3), jnp.float32)
        s, b = bn_fold(next(keys), c)
        wk = wk * s[:, None, None, None]
        taps = jnp.zeros((9, c, c_pad), jnp.float32)
        for ky in range(3):
            for kx in range(3):
                taps = taps.at[ky * 3 + kx, :, :c_].set(wk[:, :, ky, kx])
        m2_w.append(taps)
        m2_b.append(b.reshape(c, 1))

    params["m1_w"] = jnp.stack(m1_w).astype(jnp.bfloat16)        # (3, c_pad, c)
    params["m1_b"] = jnp.stack(m1_b)                             # (3, c_pad, 1)
    params["m2_w"] = jnp.concatenate(m2_w).astype(jnp.bfloat16)  # (27, c, c_pad)
    params["m2_b"] = jnp.stack(m2_b)                             # (3, c, 1)

    # conv1: nn.Conv2d(6c -> c2, 1x1) with bias (no BN).
    params["conv1_w"] = (0.1 * jax.random.normal(
        next(keys), (c2, 6 * c), jnp.float32)).astype(jnp.bfloat16)
    params["conv1_b"] = (0.1 * jax.random.normal(
        next(keys), (c2,), jnp.float32)).reshape(c2, 1)
    return params


# ----------------------------------------------------------------------------
# DCSPM forward (NCHW in / NCHW out, matching the PyTorch module)
# ----------------------------------------------------------------------------
def dcspm_forward(params, x_nchw, xgrad_nchw):
    n, c1, h, w = x_nchw.shape
    c = xgrad_nchw.shape[1]
    c2 = params["conv1_w"].shape[0]
    hw = h * w

    # Channel-major, spatially-flattened layout: (N, C, H*W) -> lane dim 256.
    x = x_nchw.reshape(n, c1, hw).astype(jnp.bfloat16)
    xg = xgrad_nchw.reshape(n, c, hw).astype(jnp.bfloat16)
    masks = _build_tap_masks(h, w, DILATIONS)                    # (27, 1, hw)

    kernel = functools.partial(_dcspm_fused_kernel, w=w, dilations=DILATIONS)

    def full_spec(a):
        return pl.BlockSpec(a.shape, lambda *_: (0,) * a.ndim)

    out = pl.pallas_call(
        kernel,
        grid=(n,),
        in_specs=[
            pl.BlockSpec((1, c1, hw), lambda b: (b, 0, 0)),
            pl.BlockSpec((1, c, hw), lambda b: (b, 0, 0)),
            full_spec(masks),
            full_spec(params["cv1_w"]), full_spec(params["cv1_b"]),
            full_spec(params["m1_w"]), full_spec(params["m1_b"]),
            full_spec(params["m2_w"]), full_spec(params["m2_b"]),
            full_spec(params["conv1_w"]), full_spec(params["conv1_b"]),
        ],
        out_specs=pl.BlockSpec((1, c2, hw), lambda b: (b, 0, 0)),
        out_shape=jax.ShapeDtypeStruct((n, c2, hw), jnp.float32),
        compiler_params=pltpu.CompilerParams(
            dimension_semantics=("parallel",),      # shard batch over TCs (v7x)
            vmem_limit_bytes=32 * 1024 * 1024,
        ),
    )(x, xg, masks, params["cv1_w"], params["cv1_b"],
      params["m1_w"], params["m1_b"], params["m2_w"], params["m2_b"],
      params["conv1_w"], params["conv1_b"])
    return out.reshape(n, c2, h, w)


# ----------------------------------------------------------------------------
# Pure-JAX reference (same folded bf16 weights; mirrors the MXU's bf16 inputs)
# ----------------------------------------------------------------------------
def dcspm_reference(params, x_nchw, xgrad_nchw):
    f32 = jnp.float32
    hp = jax.lax.Precision.HIGHEST

    def rnd(a):   # mirror the bf16 rounding applied to every MXU operand
        return a.astype(jnp.bfloat16).astype(f32)

    def up(a):
        return a.astype(f32)

    def pw(inp, wmat, bias):
        out = jnp.einsum("oi,nihw->nohw", up(wmat), rnd(inp), precision=hp)
        return jnp.maximum(out + bias.reshape(1, -1, 1, 1), 0.0)

    n, _, h, w = x_nchw.shape
    c = params["conv1_w"].shape[1] // 6

    xb = rnd(x_nchw)
    xgb = rnd(xgrad_nchw)

    y = pw(xb, params["cv1_w"], params["cv1_b"])
    y0, y1 = y[:, :c], y[:, c:]

    cur = y1
    branch = []
    for i, d in enumerate(DILATIONS):
        t = pw(cur, params["m1_w"][i], params["m1_b"][i])
        tp = jnp.pad(rnd(t), ((0, 0), (0, 0), (d, d), (d, d)))
        acc = jnp.zeros((n, c, h, w), f32)
        for ky in range(3):
            for kx in range(3):
                patch = tp[:, :, ky * d:ky * d + h, kx * d:kx * d + w]
                acc = acc + jnp.einsum(
                    "oi,nihw->nohw", up(params["m2_w"][i * 9 + ky * 3 + kx]),
                    patch, precision=hp)
        cur = jnp.maximum(acc + params["m2_b"][i].reshape(1, -1, 1, 1), 0.0)
        branch.append(cur)

    cat = jnp.concatenate([y1, branch[0], branch[1], branch[2], y0, xgb], axis=1)
    res = jnp.einsum("oi,nihw->nohw", up(params["conv1_w"]), rnd(cat),
                     precision=hp)
    res = res + params["conv1_b"].reshape(1, -1, 1, 1) + xb
    return jnp.maximum(res, 0.0)


# ----------------------------------------------------------------------------
if __name__ == "__main__":
    # Residual `result1 + x` requires c1 == c2; x_grad supplies the remaining
    # c = c2//4 channels of the 6c-wide concatenation.
    N, C1, C2, H, W = 2, 32, 32, 16, 16
    C = int(C2 * 0.25)

    key = jax.random.PRNGKey(0)
    kp, kx, kg = jax.random.split(key, 3)
    params = init_dcspm_params(kp, C1, C2)

    x = jax.random.normal(kx, (N, C1, H, W), jnp.float32)
    x_grad = jax.random.normal(kg, (N, C, H, W), jnp.float32)

    out = jax.jit(dcspm_forward)(params, x, x_grad)
    out = jax.block_until_ready(out)

    assert out.shape == (N, C2, H, W), out.shape
    assert bool(jnp.all(jnp.isfinite(out)))
    assert bool(jnp.all(out >= 0.0))          # final ReLU

    ref = dcspm_reference(params, x, x_grad)
    max_err = float(jnp.max(jnp.abs(out - ref)))
    assert max_err < 3e-2, f"max abs error vs reference: {max_err}"

    print("KERNEL_OK")
</pallas_src>

<mosaic_0001>
module attributes {stable_mosaic.version = 11 : i64} {
  func.func @_dcspm_fused_kernel(%arg0: i32, %arg1: memref<1x32x256xbf16, #tpu.memory_space<vmem>>, %arg2: memref<1x8x256xbf16, #tpu.memory_space<vmem>>, %arg3: memref<27x1x256xf32, #tpu.memory_space<vmem>>, %arg4: memref<16x32xbf16, #tpu.memory_space<vmem>>, %arg5: memref<16x1xf32, #tpu.memory_space<vmem>>, %arg6: memref<3x8x8xbf16, #tpu.memory_space<vmem>>, %arg7: memref<3x8x1xf32, #tpu.memory_space<vmem>>, %arg8: memref<27x8x8xbf16, #tpu.memory_space<vmem>>, %arg9: memref<3x8x1xf32, #tpu.memory_space<vmem>>, %arg10: memref<32x48xbf16, #tpu.memory_space<vmem>>, %arg11: memref<32x1xf32, #tpu.memory_space<vmem>>, %arg12: memref<1x32x256xf32, #tpu.memory_space<vmem>>) attributes {dimension_semantics = [#tpu.dimension_semantics<parallel>], iteration_bounds = array<i64: 2>, scalar_prefetch = 0 : i64, scratch_operands = 0 : i64, tpu.core_type = #tpu.core_type<tc>, window_params = [{transform_indices = @transform_0, window_bounds = array<i64: 1, 32, 256>}, {transform_indices = @transform_1, window_bounds = array<i64: 1, 8, 256>}, {pipeline_mode = #tpu.pipeline_mode<synchronous>, transform_indices = @transform_2, window_bounds = array<i64: 27, 1, 256>}, {pipeline_mode = #tpu.pipeline_mode<synchronous>, transform_indices = @transform_3, window_bounds = array<i64: 16, 32>}, {pipeline_mode = #tpu.pipeline_mode<synchronous>, transform_indices = @transform_4, window_bounds = array<i64: 16, 1>}, {pipeline_mode = #tpu.pipeline_mode<synchronous>, transform_indices = @transform_5, window_bounds = array<i64: 3, 8, 8>}, {pipeline_mode = #tpu.pipeline_mode<synchronous>, transform_indices = @transform_6, window_bounds = array<i64: 3, 8, 1>}, {pipeline_mode = #tpu.pipeline_mode<synchronous>, transform_indices = @transform_7, window_bounds = array<i64: 27, 8, 8>}, {pipeline_mode = #tpu.pipeline_mode<synchronous>, transform_indices = @transform_8, window_bounds = array<i64: 3, 8, 1>}, {pipeline_mode = #tpu.pipeline_mode<synchronous>, transform_indices = @transform_9, window_bounds = array<i64: 32, 48>}, {pipeline_mode = #tpu.pipeline_mode<synchronous>, transform_indices = @transform_10, window_bounds = array<i64: 32, 1>}, {transform_indices = @transform_11, window_bounds = array<i64: 1, 32, 256>}]} {
    %c0 = arith.constant 0 : index
    %c0_0 = arith.constant 0 : index
    %c0_1 = arith.constant 0 : index
    %0 = vector.load %arg1[%c0, %c0_0, %c0_1] : memref<1x32x256xbf16, #tpu.memory_space<vmem>>, vector<1x32x256xbf16>
    %1 = vector.shape_cast %0 : vector<1x32x256xbf16> to vector<32x256xbf16>
    %c0_2 = arith.constant 0 : index
    %c0_3 = arith.constant 0 : index
    %2 = vector.load %arg4[%c0_2, %c0_3] : memref<16x32xbf16, #tpu.memory_space<vmem>>, vector<16x32xbf16>
    %cst = arith.constant dense<0.000000e+00> : vector<16x256xf32>
    %3 = tpu.matmul %2, %1, %cst {dimension_numbers = #tpu.dot_dimension_numbers<[1], [0], [0], [1], [0, 0, 1, 1], [], []>} : vector<16x32xbf16>, vector<32x256xbf16>, vector<16x256xf32> -> vector<16x256xf32>
    %c0_4 = arith.constant 0 : index
    %c0_5 = arith.constant 0 : index
    %4 = vector.load %arg5[%c0_4, %c0_5] : memref<16x1xf32, #tpu.memory_space<vmem>>, vector<16x1xf32>
    %5 = vector.broadcast %4 : vector<16x1xf32> to vector<16x256xf32>
    %6 = arith.addf %3, %5 : vector<16x256xf32>
    %cst_6 = arith.constant 0.000000e+00 : f32
    %7 = vector.broadcast %cst_6 : f32 to vector<16x256xf32>
    %8 = arith.maximumf %6, %7 : vector<16x256xf32>
    %9 = vector.extract_strided_slice %8 {offsets = [0, 0], sizes = [8, 256], strides = [1, 1]} : vector<16x256xf32> to vector<8x256xf32>
    %10 = vector.extract_strided_slice %8 {offsets = [8, 0], sizes = [8, 256], strides = [1, 1]} : vector<16x256xf32> to vector<8x256xf32>
    %c0_7 = arith.constant 0 : index
    %c0_8 = arith.constant 0 : index
    %c0_9 = arith.constant 0 : index
    %11 = vector.load %arg6[%c0_7, %c0_8, %c0_9] : memref<3x8x8xbf16, #tpu.memory_space<vmem>>, vector<1x8x8xbf16>
    %12 = vector.shape_cast %11 : vector<1x8x8xbf16> to vector<8x8xbf16>
    %13 = arith.truncf %10 : vector<8x256xf32> to vector<8x256xbf16>
    %cst_10 = arith.constant dense<0.000000e+00> : vector<8x256xf32>
    %14 = tpu.matmul %12, %13, %cst_10 {dimension_numbers = #tpu.dot_dimension_numbers<[1], [0], [0], [1], [0, 0, 1, 1], [], []>} : vector<8x8xbf16>, vector<8x256xbf16>, vector<8x256xf32> -> vector<8x256xf32>
    %c0_11 = arith.constant 0 : index
    %c0_12 = arith.constant 0 : index
    %c0_13 = arith.constant 0 : index
    %15 = vector.load %arg7[%c0_11, %c0_12, %c0_13] : memref<3x8x1xf32, #tpu.memory_space<vmem>>, vector<1x8x1xf32>
    %16 = vector.shape_cast %15 : vector<1x8x1xf32> to vector<8x1xf32>
    %17 = vector.broadcast %16 : vector<8x1xf32> to vector<8x256xf32>
    %18 = arith.addf %14, %17 : vector<8x256xf32>
    %cst_14 = arith.constant 0.000000e+00 : f32
    %19 = vector.broadcast %cst_14 : f32 to vector<8x256xf32>
    %20 = arith.maximumf %18, %19 : vector<8x256xf32>
    %cst_15 = arith.constant 0.000000e+00 : f32
    %21 = vector.broadcast %cst_15 : f32 to vector<8x256xf32>
    %c51_i32 = arith.constant 51 : i32
    %22 = tpu.dynamic_rotate %20 by %c51_i32 dim 1 : vector<8x256xf32>, i32 -> vector<8x256xf32>
    %c0_16 = arith.constant 0 : index
    %c0_17 = arith.constant 0 : index
    %c0_18 = arith.constant 0 : index
    %23 = vector.load %arg3[%c0_16, %c0_17, %c0_18] : memref<27x1x256xf32, #tpu.memory_space<vmem>>, vector<1x1x256xf32>
    %24 = vector.shape_cast %23 : vector<1x1x256xf32> to vector<1x256xf32>
    %25 = vector.broadcast %24 : vector<1x256xf32> to vector<8x256xf32>
    %26 = arith.mulf %22, %25 : vector<8x256xf32>
    %c0_19 = arith.constant 0 : index
    %c0_20 = arith.constant 0 : index
    %c0_21 = arith.constant 0 : index
    %27 = vector.load %arg8[%c0_19, %c0_20, %c0_21] : memref<27x8x8xbf16, #tpu.memory_space<vmem>>, vector<1x8x8xbf16>
    %28 = vector.shape_cast %27 : vector<1x8x8xbf16> to vector<8x8xbf16>
    %29 = arith.truncf %26 : vector<8x256xf32> to vector<8x256xbf16>
    %cst_22 = arith.constant dense<0.000000e+00> : vector<8x256xf32>
    %30 = tpu.matmul %28, %29, %cst_22 {dimension_numbers = #tpu.dot_dimension_numbers<[1], [0], [0], [1], [0, 0, 1, 1], [], []>} : vector<8x8xbf16>, vector<8x256xbf16>, vector<8x256xf32> -> vector<8x256xf32>
    %31 = arith.addf %21, %30 : vector<8x256xf32>
    %c48_i32 = arith.constant 48 : i32
    %32 = tpu.dynamic_rotate %20 by %c48_i32 dim 1 : vector<8x256xf32>, i32 -> vector<8x256xf32>
    %c1 = arith.constant 1 : index
    %c0_23 = arith.constant 0 : index
    %c0_24 = arith.constant 0 : index
    %33 = vector.load %arg3[%c1, %c0_23, %c0_24] : memref<27x1x256xf32, #tpu.memory_space<vmem>>, vector<1x1x256xf32>
    %34 = vector.shape_cast %33 : vector<1x1x256xf32> to vector<1x256xf32>
    %35 = vector.broadcast %34 : vector<1x256xf32> to vector<8x256xf32>
    %36 = arith.mulf %32, %35 : vector<8x256xf32>
    %c1_25 = arith.constant 1 : index
    %c0_26 = arith.constant 0 : index
    %c0_27 = arith.constant 0 : index
    %37 = vector.load %arg8[%c1_25, %c0_26, %c0_27] : memref<27x8x8xbf16, #tpu.memory_space<vmem>>, vector<1x8x8xbf16>
    %38 = vector.shape_cast %37 : vector<1x8x8xbf16> to vector<8x8xbf16>
    %39 = arith.truncf %36 : vector<8x256xf32> to vector<8x256xbf16>
    %cst_28 = arith.constant dense<0.000000e+00> : vector<8x256xf32>
    %40 = tpu.matmul %38, %39, %cst_28 {dimension_numbers = #tpu.dot_dimension_numbers<[1], [0], [0], [1], [0, 0, 1, 1], [], []>} : vector<8x8xbf16>, vector<8x256xbf16>, vector<8x256xf32> -> vector<8x256xf32>
    %41 = arith.addf %31, %40 : vector<8x256xf32>
    %c45_i32 = arith.constant 45 : i32
    %42 = tpu.dynamic_rotate %20 by %c45_i32 dim 1 : vector<8x256xf32>, i32 -> vector<8x256xf32>
    %c2 = arith.constant 2 : index
    %c0_29 = arith.constant 0 : index
    %c0_30 = arith.constant 0 : index
    %43 = vector.load %arg3[%c2, %c0_29, %c0_30] : memref<27x1x256xf32, #tpu.memory_space<vmem>>, vector<1x1x256xf32>
    %44 = vector.shape_cast %43 : vector<1x1x256xf32> to vector<1x256xf32>
    %45 = vector.broadcast %44 : vector<1x256xf32> to vector<8x256xf32>
    %46 = arith.mulf %42, %45 : vector<8x256xf32>
    %c2_31 = arith.constant 2 : index
    %c0_32 = arith.constant 0 : index
    %c0_33 = arith.constant 0 : index
    %47 = vector.load %arg8[%c2_31, %c0_32, %c0_33] : memref<27x8x8xbf16, #tpu.memory_space<vmem>>, vector<1x8x8xbf16>
    %48 = vector.shape_cast %47 : vector<1x8x8xbf16> to vector<8x8xbf16>
    %49 = arith.truncf %46 : vector<8x256xf32> to vector<8x256xbf16>
    %cst_34 = arith.constant dense<0.000000e+00> : vector<8x256xf32>
    %50 = tpu.matmul %48, %49, %cst_34 {dimension_numbers = #tpu.dot_dimension_numbers<[1], [0], [0], [1], [0, 0, 1, 1], [], []>} : vector<8x8xbf16>, vector<8x256xbf16>, vector<8x256xf32> -> vector<8x256xf32>
    %51 = arith.addf %41, %50 : vector<8x256xf32>
    %c3_i32 = arith.constant 3 : i32
    %52 = tpu.dynamic_rotate %20 by %c3_i32 dim 1 : vector<8x256xf32>, i32 -> vector<8x256xf32>
    %c3 = arith.constant 3 : index
    %c0_35 = arith.constant 0 : index
    %c0_36 = arith.constant 0 : index
    %53 = vector.load %arg3[%c3, %c0_35, %c0_36] : memref<27x1x256xf32, #tpu.memory_space<vmem>>, vector<1x1x256xf32>
    %54 = vector.shape_cast %53 : vector<1x1x256xf32> to vector<1x256xf32>
    %55 = vector.broadcast %54 : vector<1x256xf32> to vector<8x256xf32>
    %56 = arith.mulf %52, %55 : vector<8x256xf32>
    %c3_37 = arith.constant 3 : index
    %c0_38 = arith.constant 0 : index
    %c0_39 = arith.constant 0 : index
    %57 = vector.load %arg8[%c3_37, %c0_38, %c0_39] : memref<27x8x8xbf16, #tpu.memory_space<vmem>>, vector<1x8x8xbf16>
    %58 = vector.shape_cast %57 : vector<1x8x8xbf16> to vector<8x8xbf16>
    %59 = arith.truncf %56 : vector<8x256xf32> to vector<8x256xbf16>
    %cst_40 = arith.constant dense<0.000000e+00> : vector<8x256xf32>
    %60 = tpu.matmul %58, %59, %cst_40 {dimension_numbers = #tpu.dot_dimension_numbers<[1], [0], [0], [1], [0, 0, 1, 1], [], []>} : vector<8x8xbf16>, vector<8x256xbf16>, vector<8x256xf32> -> vector<8x256xf32>
    %61 = arith.addf %51, %60 : vector<8x256xf32>
    %c4 = arith.constant 4 : index
    %c0_41 = arith.constant 0 : index
    %c0_42 = arith.constant 0 : index
    %62 = vector.load %arg8[%c4, %c0_41, %c0_42] : memref<27x8x8xbf16, #tpu.memory_space<vmem>>, vector<1x8x8xbf16>
    %63 = vector.shape_cast %62 : vector<1x8x8xbf16> to vector<8x8xbf16>
    %64 = arith.truncf %20 : vector<8x256xf32> to vector<8x256xbf16>
    %cst_43 = arith.constant dense<0.000000e+00> : vector<8x256xf32>
    %65 = tpu.matmul %63, %64, %cst_43 {dimension_numbers = #tpu.dot_dimension_numbers<[1], [0], [0], [1], [0, 0, 1, 1], [], []>} : vector<8x8xbf16>, vector<8x256xbf16>, vector<8x256xf32> -> vector<8x256xf32>
    %66 = arith.addf %61, %65 : vector<8x256xf32>
    %c253_i32 = arith.constant 253 : i32
    %67 = tpu.dynamic_rotate %20 by %c253_i32 dim 1 : vector<8x256xf32>, i32 -> vector<8x256xf32>
    %c5 = arith.constant 5 : index
    %c0_44 = arith.constant 0 : index
    %c0_45 = arith.constant 0 : index
    %68 = vector.load %arg3[%c5, %c0_44, %c0_45] : memref<27x1x256xf32, #tpu.memory_space<vmem>>, vector<1x1x256xf32>
    %69 = vector.shape_cast %68 : vector<1x1x256xf32> to vector<1x256xf32>
    %70 = vector.broadcast %69 : vector<1x256xf32> to vector<8x256xf32>
    %71 = arith.mulf %67, %70 : vector<8x256xf32>
    %c5_46 = arith.constant 5 : index
    %c0_47 = arith.constant 0 : index
    %c0_48 = arith.constant 0 : index
    %72 = vector.load %arg8[%c5_46, %c0_47, %c0_48] : memref<27x8x8xbf16, #tpu.memory_space<vmem>>, vector<1x8x8xbf16>
    %73 = vector.shape_cast %72 : vector<1x8x8xbf16> to vector<8x8xbf16>
    %74 = arith.truncf %71 : vector<8x256xf32> to vector<8x256xbf16>
    %cst_49 = arith.constant dense<0.000000e+00> : vector<8x256xf32>
    %75 = tpu.matmul %73, %74, %cst_49 {dimension_numbers = #tpu.dot_dimension_numbers<[1], [0], [0], [1], [0, 0, 1, 1], [], []>} : vector<8x8xbf16>, vector<8x256xbf16>, vector<8x256xf32> -> vector<8x256xf32>
    %76 = arith.addf %66, %75 : vector<8x256xf32>
    %c211_i32 = arith.constant 211 : i32
    %77 = tpu.dynamic_rotate %20 by %c211_i32 dim 1 : vector<8x256xf32>, i32 -> vector<8x256xf32>
    %c6 = arith.constant 6 : index
    %c0_50 = arith.constant 0 : index
    %c0_51 = arith.constant 0 : index
    %78 = vector.load %arg3[%c6, %c0_50, %c0_51] : memref<27x1x256xf32, #tpu.memory_space<vmem>>, vector<1x1x256xf32>
    %79 = vector.shape_cast %78 : vector<1x1x256xf32> to vector<1x256xf32>
    %80 = vector.broadcast %79 : vector<1x256xf32> to vector<8x256xf32>
    %81 = arith.mulf %77, %80 : vector<8x256xf32>
    %c6_52 = arith.constant 6 : index
    %c0_53 = arith.constant 0 : index
    %c0_54 = arith.constant 0 : index
    %82 = vector.load %arg8[%c6_52, %c0_53, %c0_54] : memref<27x8x8xbf16, #tpu.memory_space<vmem>>, vector<1x8x8xbf16>
    %83 = vector.shape_cast %82 : vector<1x8x8xbf16> to vector<8x8xbf16>
    %84 = arith.truncf %81 : vector<8x256xf32> to vector<8x256xbf16>
    %cst_55 = arith.constant dense<0.000000e+00> : vector<8x256xf32>
    %85 = tpu.matmul %83, %84, %cst_55 {dimension_numbers = #tpu.dot_dimension_numbers<[1], [0], [0], [1], [0, 0, 1, 1], [], []>} : vector<8x8xbf16>, vector<8x256xbf16>, vector<8x256xf32> -> vector<8x256xf32>
    %86 = arith.addf %76, %85 : vector<8x256xf32>
    %c208_i32 = arith.constant 208 : i32
    %87 = tpu.dynamic_rotate %20 by %c208_i32 dim 1 : vector<8x256xf32>, i32 -> vector<8x256xf32>
    %c7 = arith.constant 7 : index
    %c0_56 = arith.constant 0 : index
    %c0_57 = arith.constant 0 : index
    %88 = vector.load %arg3[%c7, %c0_56, %c0_57] : memref<27x1x256xf32, #tpu.memory_space<vmem>>, vector<1x1x256xf32>
    %89 = vector.shape_cast %88 : vector<1x1x256xf32> to vector<1x256xf32>
    %90 = vector.broadcast %89 : vector<1x256xf32> to vector<8x256xf32>
    %91 = arith.mulf %87, %90 : vector<8x256xf32>
    %c7_58 = arith.constant 7 : index
    %c0_59 = arith.constant 0 : index
    %c0_60 = arith.constant 0 : index
    %92 = vector.load %arg8[%c7_58, %c0_59, %c0_60] : memref<27x8x8xbf16, #tpu.memory_space<vmem>>, vector<1x8x8xbf16>
    %93 = vector.shape_cast %92 : vector<1x8x8xbf16> to vector<8x8xbf16>
    %94 = arith.truncf %91 : vector<8x256xf32> to vector<8x256xbf16>
    %cst_61 = arith.constant dense<0.000000e+00> : vector<8x256xf32>
    %95 = tpu.matmul %93, %94, %cst_61 {dimension_numbers = #tpu.dot_dimension_numbers<[1], [0], [0], [1], [0, 0, 1, 1], [], []>} : vector<8x8xbf16>, vector<8x256xbf16>, vector<8x256xf32> -> vector<8x256xf32>
    %96 = arith.addf %86, %95 : vector<8x256xf32>
    %c205_i32 = arith.constant 205 : i32
    %97 = tpu.dynamic_rotate %20 by %c205_i32 dim 1 : vector<8x256xf32>, i32 -> vector<8x256xf32>
    %c8 = arith.constant 8 : index
    %c0_62 = arith.constant 0 : index
    %c0_63 = arith.constant 0 : index
    %98 = vector.load %arg3[%c8, %c0_62, %c0_63] : memref<27x1x256xf32, #tpu.memory_space<vmem>>, vector<1x1x256xf32>
    %99 = vector.shape_cast %98 : vector<1x1x256xf32> to vector<1x256xf32>
    %100 = vector.broadcast %99 : vector<1x256xf32> to vector<8x256xf32>
    %101 = arith.mulf %97, %100 : vector<8x256xf32>
    %c8_64 = arith.constant 8 : index
    %c0_65 = arith.constant 0 : index
    %c0_66 = arith.constant 0 : index
    %102 = vector.load %arg8[%c8_64, %c0_65, %c0_66] : memref<27x8x8xbf16, #tpu.memory_space<vmem>>, vector<1x8x8xbf16>
    %103 = vector.shape_cast %102 : vector<1x8x8xbf16> to vector<8x8xbf16>
    %104 = arith.truncf %101 : vector<8x256xf32> to vector<8x256xbf16>
    %cst_67 = arith.constant dense<0.000000e+00> : vector<8x256xf32>
    %105 = tpu.matmul %103, %104, %cst_67 {dimension_numbers = #tpu.dot_dimension_numbers<[1], [0], [0], [1], [0, 0, 1, 1], [], []>} : vector<8x8xbf16>, vector<8x256xbf16>, vector<8x256xf32> -> vector<8x256xf32>
    %106 = arith.addf %96, %105 : vector<8x256xf32>
    %c0_68 = arith.constant 0 : index
    %c0_69 = arith.constant 0 : index
    %c0_70 = arith.constant 0 : index
    %107 = vector.load %arg9[%c0_68, %c0_69, %c0_70] : memref<3x8x1xf32, #tpu.memory_space<vmem>>, vector<1x8x1xf32>
    %108 = vector.shape_cast %107 : vector<1x8x1xf32> to vector<8x1xf32>
    %109 = vector.broadcast %108 : vector<8x1xf32> to vector<8x256xf32>
    %110 = arith.addf %106, %109 : vector<8x256xf32>
    %cst_71 = arith.constant 0.000000e+00 : f32
    %111 = vector.broadcast %cst_71 : f32 to vector<8x256xf32>
    %112 = arith.maximumf %110, %111 : vector<8x256xf32>
    %c1_72 = arith.constant 1 : index
    %c0_73 = arith.constant 0 : index
    %c0_74 = arith.constant 0 : index
    %113 = vector.load %arg6[%c1_72, %c0_73, %c0_74] : memref<3x8x8xbf16, #tpu.memory_space<vmem>>, vector<1x8x8xbf16>
    %114 = vector.shape_cast %113 : vector<1x8x8xbf16> to vector<8x8xbf16>
    %115 = arith.truncf %112 : vector<8x256xf32> to vector<8x256xbf16>
    %cst_75 = arith.constant dense<0.000000e+00> : vector<8x256xf32>
    %116 = tpu.matmul %114, %115, %cst_75 {dimension_numbers = #tpu.dot_dimension_numbers<[1], [0], [0], [1], [0, 0, 1, 1], [], []>} : vector<8x8xbf16>, vector<8x256xbf16>, vector<8x256xf32> -> vector<8x256xf32>
    %c1_76 = arith.constant 1 : index
    %c0_77 = arith.constant 0 : index
    %c0_78 = arith.constant 0 : index
    %117 = vector.load %arg7[%c1_76, %c0_77, %c0_78] : memref<3x8x1xf32, #tpu.memory_space<vmem>>, vector<1x8x1xf32>
    %118 = vector.shape_cast %117 : vector<1x8x1xf32> to vector<8x1xf32>
    %119 = vector.broadcast %118 : vector<8x1xf32> to vector<8x256xf32>
    %120 = arith.addf %116, %119 : vector<8x256xf32>
    %cst_79 = arith.constant 0.000000e+00 : f32
    %121 = vector.broadcast %cst_79 : f32 to vector<8x256xf32>
    %122 = arith.maximumf %120, %121 : vector<8x256xf32>
    %cst_80 = arith.constant 0.000000e+00 : f32
    %123 = vector.broadcast %cst_80 : f32 to vector<8x256xf32>
    %c85_i32 = arith.constant 85 : i32
    %124 = tpu.dynamic_rotate %122 by %c85_i32 dim 1 : vector<8x256xf32>, i32 -> vector<8x256xf32>
    %c9 = arith.constant 9 : index
    %c0_81 = arith.constant 0 : index
    %c0_82 = arith.constant 0 : index
    %125 = vector.load %arg3[%c9, %c0_81, %c0_82] : memref<27x1x256xf32, #tpu.memory_space<vmem>>, vector<1x1x256xf32>
    %126 = vector.shape_cast %125 : vector<1x1x256xf32> to vector<1x256xf32>
    %127 = vector.broadcast %126 : vector<1x256xf32> to vector<8x256xf32>
    %128 = arith.mulf %124, %127 : vector<8x256xf32>
    %c9_83 = arith.constant 9 : index
    %c0_84 = arith.constant 0 : index
    %c0_85 = arith.constant 0 : index
    %129 = vector.load %arg8[%c9_83, %c0_84, %c0_85] : memref<27x8x8xbf16, #tpu.memory_space<vmem>>, vector<1x8x8xbf16>
    %130 = vector.shape_cast %129 : vector<1x8x8xbf16> to vector<8x8xbf16>
    %131 = arith.truncf %128 : vector<8x256xf32> to vector<8x256xbf16>
    %cst_86 = arith.constant dense<0.000000e+00> : vector<8x256xf32>
    %132 = tpu.matmul %130, %131, %cst_86 {dimension_numbers = #tpu.dot_dimension_numbers<[1], [0], [0], [1], [0, 0, 1, 1], [], []>} : vector<8x8xbf16>, vector<8x256xbf16>, vector<8x256xf32> -> vector<8x256xf32>
    %133 = arith.addf %123, %132 : vector<8x256xf32>
    %c80_i32 = arith.constant 80 : i32
    %134 = tpu.dynamic_rotate %122 by %c80_i32 dim 1 : vector<8x256xf32>, i32 -> vector<8x256xf32>
    %c10 = arith.constant 10 : index
    %c0_87 = arith.constant 0 : index
    %c0_88 = arith.constant 0 : index
    %135 = vector.load %arg3[%c10, %c0_87, %c0_88] : memref<27x1x256xf32, #tpu.memory_space<vmem>>, vector<1x1x256xf32>
    %136 = vector.shape_cast %135 : vector<1x1x256xf32> to vector<1x256xf32>
    %137 = vector.broadcast %136 : vector<1x256xf32> to vector<8x256xf32>
    %138 = arith.mulf %134, %137 : vector<8x256xf32>
    %c10_89 = arith.constant 10 : index
    %c0_90 = arith.constant 0 : index
    %c0_91 = arith.constant 0 : index
    %139 = vector.load %arg8[%c10_89, %c0_90, %c0_91] : memref<27x8x8xbf16, #tpu.memory_space<vmem>>, vector<1x8x8xbf16>
    %140 = vector.shape_cast %139 : vector<1x8x8xbf16> to vector<8x8xbf16>
    %141 = arith.truncf %138 : vector<8x256xf32> to vector<8x256xbf16>
    %cst_92 = arith.constant dense<0.000000e+00> : vector<8x256xf32>
    %142 = tpu.matmul %140, %141, %cst_92 {dimension_numbers = #tpu.dot_dimension_numbers<[1], [0], [0], [1], [0, 0, 1, 1], [], []>} : vector<8x8xbf16>, vector<8x256xbf16>, vector<8x256xf32> -> vector<8x256xf32>
    %143 = arith.addf %133, %142 : vector<8x256xf32>
    %c75_i32 = arith.constant 75 : i32
    %144 = tpu.dynamic_rotate %122 by %c75_i32 dim 1 : vector<8x256xf32>, i32 -> vector<8x256xf32>
    %c11 = arith.constant 11 : index
    %c0_93 = arith.constant 0 : index
    %c0_94 = arith.constant 0 : index
    %145 = vector.load %arg3[%c11, %c0_93, %c0_94] : memref<27x1x256xf32, #tpu.memory_space<vmem>>, vector<1x1x256xf32>
    %146 = vector.shape_cast %145 : vector<1x1x256xf32> to vector<1x256xf32>
    %147 = vector.broadcast %146 : vector<1x256xf32> to vector<8x256xf32>
    %148 = arith.mulf %144, %147 : vector<8x256xf32>
    %c11_95 = arith.constant 11 : index
    %c0_96 = arith.constant 0 : index
    %c0_97 = arith.constant 0 : index
    %149 = vector.load %arg8[%c11_95, %c0_96, %c0_97] : memref<27x8x8xbf16, #tpu.memory_space<vmem>>, vector<1x8x8xbf16>
    %150 = vector.shape_cast %149 : vector<1x8x8xbf16> to vector<8x8xbf16>
    %151 = arith.truncf %148 : vector<8x256xf32> to vector<8x256xbf16>
    %cst_98 = arith.constant dense<0.000000e+00> : vector<8x256xf32>
    %152 = tpu.matmul %150, %151, %cst_98 {dimension_numbers = #tpu.dot_dimension_numbers<[1], [0], [0], [1], [0, 0, 1, 1], [], []>} : vector<8x8xbf16>, vector<8x256xbf16>, vector<8x256xf32> -> vector<8x256xf32>
    %153 = arith.addf %143, %152 : vector<8x256xf32>
    %c5_i32 = arith.constant 5 : i32
    %154 = tpu.dynamic_rotate %122 by %c5_i32 dim 1 : vector<8x256xf32>, i32 -> vector<8x256xf32>
    %c12 = arith.constant 12 : index
    %c0_99 = arith.constant 0 : index
    %c0_100 = arith.constant 0 : index
    %155 = vector.load %arg3[%c12, %c0_99, %c0_100] : memref<27x1x256xf32, #tpu.memory_space<vmem>>, vector<1x1x256xf32>
    %156 = vector.shape_cast %155 : vector<1x1x256xf32> to vector<1x256xf32>
    %157 = vector.broadcast %156 : vector<1x256xf32> to vector<8x256xf32>
    %158 = arith.mulf %154, %157 : vector<8x256xf32>
    %c12_101 = arith.constant 12 : index
    %c0_102 = arith.constant 0 : index
    %c0_103 = arith.constant 0 : index
    %159 = vector.load %arg8[%c12_101, %c0_102, %c0_103] : memref<27x8x8xbf16, #tpu.memory_space<vmem>>, vector<1x8x8xbf16>
    %160 = vector.shape_cast %159 : vector<1x8x8xbf16> to vector<8x8xbf16>
    %161 = arith.truncf %158 : vector<8x256xf32> to vector<8x256xbf16>
    %cst_104 = arith.constant dense<0.000000e+00> : vector<8x256xf32>
    %162 = tpu.matmul %160, %161, %cst_104 {dimension_numbers = #tpu.dot_dimension_numbers<[1], [0], [0], [1], [0, 0, 1, 1], [], []>} : vector<8x8xbf16>, vector<8x256xbf16>, vector<8x256xf32> -> vector<8x256xf32>
    %163 = arith.addf %153, %162 : vector<8x256xf32>
    %c13 = arith.constant 13 : index
    %c0_105 = arith.constant 0 : index
    %c0_106 = arith.constant 0 : index
    %164 = vector.load %arg8[%c13, %c0_105, %c0_106] : memref<27x8x8xbf16, #tpu.memory_space<vmem>>, vector<1x8x8xbf16>
    %165 = vector.shape_cast %164 : vector<1x8x8xbf16> to vector<8x8xbf16>
    %166 = arith.truncf %122 : vector<8x256xf32> to vector<8x256xbf16>
    %cst_107 = arith.constant dense<0.000000e+00> : vector<8x256xf32>
    %167 = tpu.matmul %165, %166, %cst_107 {dimension_numbers = #tpu.dot_dimension_numbers<[1], [0], [0], [1], [0, 0, 1, 1], [], []>} : vector<8x8xbf16>, vector<8x256xbf16>, vector<8x256xf32> -> vector<8x256xf32>
    %168 = arith.addf %163, %167 : vector<8x256xf32>
    %c251_i32 = arith.constant 251 : i32
    %169 = tpu.dynamic_rotate %122 by %c251_i32 dim 1 : vector<8x256xf32>, i32 -> vector<8x256xf32>
    %c14 = arith.constant 14 : index
    %c0_108 = arith.constant 0 : index
    %c0_109 = arith.constant 0 : index
    %170 = vector.load %arg3[%c14, %c0_108, %c0_109] : memref<27x1x256xf32, #tpu.memory_space<vmem>>, vector<1x1x256xf32>
    %171 = vector.shape_cast %170 : vector<1x1x256xf32> to vector<1x256xf32>
    %172 = vector.broadcast %171 : vector<1x256xf32> to vector<8x256xf32>
    %173 = arith.mulf %169, %172 : vector<8x256xf32>
    %c14_110 = arith.constant 14 : index
    %c0_111 = arith.constant 0 : index
    %c0_112 = arith.constant 0 : index
    %174 = vector.load %arg8[%c14_110, %c0_111, %c0_112] : memref<27x8x8xbf16, #tpu.memory_space<vmem>>, vector<1x8x8xbf16>
    %175 = vector.shape_cast %174 : vector<1x8x8xbf16> to vector<8x8xbf16>
    %176 = arith.truncf %173 : vector<8x256xf32> to vector<8x256xbf16>
    %cst_113 = arith.constant dense<0.000000e+00> : vector<8x256xf32>
    %177 = tpu.matmul %175, %176, %cst_113 {dimension_numbers = #tpu.dot_dimension_numbers<[1], [0], [0], [1], [0, 0, 1, 1], [], []>} : vector<8x8xbf16>, vector<8x256xbf16>, vector<8x256xf32> -> vector<8x256xf32>
    %178 = arith.addf %168, %177 : vector<8x256xf32>
    %c181_i32 = arith.constant 181 : i32
    %179 = tpu.dynamic_rotate %122 by %c181_i32 dim 1 : vector<8x256xf32>, i32 -> vector<8x256xf32>
    %c15 = arith.constant 15 : index
    %c0_114 = arith.constant 0 : index
    %c0_115 = arith.constant 0 : index
    %180 = vector.load %arg3[%c15, %c0_114, %c0_115] : memref<27x1x256xf32, #tpu.memory_space<vmem>>, vector<1x1x256xf32>
    %181 = vector.shape_cast %180 : vector<1x1x256xf32> to vector<1x256xf32>
    %182 = vector.broadcast %181 : vector<1x256xf32> to vector<8x256xf32>
    %183 = arith.mulf %179, %182 : vector<8x256xf32>
    %c15_116 = arith.constant 15 : index
    %c0_117 = arith.constant 0 : index
    %c0_118 = arith.constant 0 : index
    %184 = vector.load %arg8[%c15_116, %c0_117, %c0_118] : memref<27x8x8xbf16, #tpu.memory_space<vmem>>, vector<1x8x8xbf16>
    %185 = vector.shape_cast %184 : vector<1x8x8xbf16> to vector<8x8xbf16>
    %186 = arith.truncf %183 : vector<8x256xf32> to vector<8x256xbf16>
    %cst_119 = arith.constant dense<0.000000e+00> : vector<8x256xf32>
    %187 = tpu.matmul %185, %186, %cst_119 {dimension_numbers = #tpu.dot_dimension_numbers<[1], [0], [0], [1], [0, 0, 1, 1], [], []>} : vector<8x8xbf16>, vector<8x256xbf16>, vector<8x256xf32> -> vector<8x256xf32>
    %188 = arith.addf %178, %187 : vector<8x256xf32>
    %c176_i32 = arith.constant 176 : i32
    %189 = tpu.dynamic_rotate %122 by %c176_i32 dim 1 : vector<8x256xf32>, i32 -> vector<8x256xf32>
    %c16 = arith.constant 16 : index
    %c0_120 = arith.constant 0 : index
    %c0_121 = arith.constant 0 : index
    %190 = vector.load %arg3[%c16, %c0_120, %c0_121] : memref<27x1x256xf32, #tpu.memory_space<vmem>>, vector<1x1x256xf32>
    %191 = vector.shape_cast %190 : vector<1x1x256xf32> to vector<1x256xf32>
    %192 = vector.broadcast %191 : vector<1x256xf32> to vector<8x256xf32>
    %193 = arith.mulf %189, %192 : vector<8x256xf32>
    %c16_122 = arith.constant 16 : index
    %c0_123 = arith.constant 0 : index
    %c0_124 = arith.constant 0 : index
    %194 = vector.load %arg8[%c16_122, %c0_123, %c0_124] : memref<27x8x8xbf16, #tpu.memory_space<vmem>>, vector<1x8x8xbf16>
    %195 = vector.shape_cast %194 : vector<1x8x8xbf16> to vector<8x8xbf16>
    %196 = arith.truncf %193 : vector<8x256xf32> to vector<8x256xbf16>
    %cst_125 = arith.constant dense<0.000000e+00> : vector<8x256xf32>
    %197 = tpu.matmul %195, %196, %cst_125 {dimension_numbers = #tpu.dot_dimension_numbers<[1], [0], [0], [1], [0, 0, 1, 1], [], []>} : vector<8x8xbf16>, vector<8x256xbf16>, vector<8x256xf32> -> vector<8x256xf32>
    %198 = arith.addf %188, %197 : vector<8x256xf32>
    %c171_i32 = arith.constant 171 : i32
    %199 = tpu.dynamic_rotate %122 by %c171_i32 dim 1 : vector<8x256xf32>, i32 -> vector<8x256xf32>
    %c17 = arith.constant 17 : index
    %c0_126 = arith.constant 0 : index
    %c0_127 = arith.constant 0 : index
    %200 = vector.load %arg3[%c17, %c0_126, %c0_127] : memref<27x1x256xf32, #tpu.memory_space<vmem>>, vector<1x1x256xf32>
    %201 = vector.shape_cast %200 : vector<1x1x256xf32> to vector<1x256xf32>
    %202 = vector.broadcast %201 : vector<1x256xf32> to vector<8x256xf32>
    %203 = arith.mulf %199, %202 : vector<8x256xf32>
    %c17_128 = arith.constant 17 : index
    %c0_129 = arith.constant 0 : index
    %c0_130 = arith.constant 0 : index
    %204 = vector.load %arg8[%c17_128, %c0_129, %c0_130] : memref<27x8x8xbf16, #tpu.memory_space<vmem>>, vector<1x8x8xbf16>
    %205 = vector.shape_cast %204 : vector<1x8x8xbf16> to vector<8x8xbf16>
    %206 = arith.truncf %203 : vector<8x256xf32> to vector<8x256xbf16>
    %cst_131 = arith.constant dense<0.000000e+00> : vector<8x256xf32>
    %207 = tpu.matmul %205, %206, %cst_131 {dimension_numbers = #tpu.dot_dimension_numbers<[1], [0], [0], [1], [0, 0, 1, 1], [], []>} : vector<8x8xbf16>, vector<8x256xbf16>, vector<8x256xf32> -> vector<8x256xf32>
    %208 = arith.addf %198, %207 : vector<8x256xf32>
    %c1_132 = arith.constant 1 : index
    %c0_133 = arith.constant 0 : index
    %c0_134 = arith.constant 0 : index
    %209 = vector.load %arg9[%c1_132, %c0_133, %c0_134] : memref<3x8x1xf32, #tpu.memory_space<vmem>>, vector<1x8x1xf32>
    %210 = vector.shape_cast %209 : vector<1x8x1xf32> to vector<8x1xf32>
    %211 = vector.broadcast %210 : vector<8x1xf32> to vector<8x256xf32>
    %212 = arith.addf %208, %211 : vector<8x256xf32>
    %cst_135 = arith.constant 0.000000e+00 : f32
    %213 = vector.broadcast %cst_135 : f32 to vector<8x256xf32>
    %214 = arith.maximumf %212, %213 : vector<8x256xf32>
    %c2_136 = arith.constant 2 : index
    %c0_137 = arith.constant 0 : index
    %c0_138 = arith.constant 0 : index
    %215 = vector.load %arg6[%c2_136, %c0_137, %c0_138] : memref<3x8x8xbf16, #tpu.memory_space<vmem>>, vector<1x8x8xbf16>
    %216 = vector.shape_cast %215 : vector<1x8x8xbf16> to vector<8x8xbf16>
    %217 = arith.truncf %214 : vector<8x256xf32> to vector<8x256xbf16>
    %cst_139 = arith.constant dense<0.000000e+00> : vector<8x256xf32>
    %218 = tpu.matmul %216, %217, %cst_139 {dimension_numbers = #tpu.dot_dimension_numbers<[1], [0], [0], [1], [0, 0, 1, 1], [], []>} : vector<8x8xbf16>, vector<8x256xbf16>, vector<8x256xf32> -> vector<8x256xf32>
    %c2_140 = arith.constant 2 : index
    %c0_141 = arith.constant 0 : index
    %c0_142 = arith.constant 0 : index
    %219 = vector.load %arg7[%c2_140, %c0_141, %c0_142] : memref<3x8x1xf32, #tpu.memory_space<vmem>>, vector<1x8x1xf32>
    %220 = vector.shape_cast %219 : vector<1x8x1xf32> to vector<8x1xf32>
    %221 = vector.broadcast %220 : vector<8x1xf32> to vector<8x256xf32>
    %222 = arith.addf %218, %221 : vector<8x256xf32>
    %cst_143 = arith.constant 0.000000e+00 : f32
    %223 = vector.broadcast %cst_143 : f32 to vector<8x256xf32>
    %224 = arith.maximumf %222, %223 : vector<8x256xf32>
    %cst_144 = arith.constant 0.000000e+00 : f32
    %225 = vector.broadcast %cst_144 : f32 to vector<8x256xf32>
    %c119_i32 = arith.constant 119 : i32
    %226 = tpu.dynamic_rotate %224 by %c119_i32 dim 1 : vector<8x256xf32>, i32 -> vector<8x256xf32>
    %c18 = arith.constant 18 : index
    %c0_145 = arith.constant 0 : index
    %c0_146 = arith.constant 0 : index
    %227 = vector.load %arg3[%c18, %c0_145, %c0_146] : memref<27x1x256xf32, #tpu.memory_space<vmem>>, vector<1x1x256xf32>
    %228 = vector.shape_cast %227 : vector<1x1x256xf32> to vector<1x256xf32>
    %229 = vector.broadcast %228 : vector<1x256xf32> to vector<8x256xf32>
    %230 = arith.mulf %226, %229 : vector<8x256xf32>
    %c18_147 = arith.constant 18 : index
    %c0_148 = arith.constant 0 : index
    %c0_149 = arith.constant 0 : index
    %231 = vector.load %arg8[%c18_147, %c0_148, %c0_149] : memref<27x8x8xbf16, #tpu.memory_space<vmem>>, vector<1x8x8xbf16>
    %232 = vector.shape_cast %231 : vector<1x8x8xbf16> to vector<8x8xbf16>
    %233 = arith.truncf %230 : vector<8x256xf32> to vector<8x256xbf16>
    %cst_150 = arith.constant dense<0.000000e+00> : vector<8x256xf32>
    %234 = tpu.matmul %232, %233, %cst_150 {dimension_numbers = #tpu.dot_dimension_numbers<[1], [0], [0], [1], [0, 0, 1, 1], [], []>} : vector<8x8xbf16>, vector<8x256xbf16>, vector<8x256xf32> -> vector<8x256xf32>
    %235 = arith.addf %225, %234 : vector<8x256xf32>
    %c112_i32 = arith.constant 112 : i32
    %236 = tpu.dynamic_rotate %224 by %c112_i32 dim 1 : vector<8x256xf32>, i32 -> vector<8x256xf32>
    %c19 = arith.constant 19 : index
    %c0_151 = arith.constant 0 : index
    %c0_152 = arith.constant 0 : index
    %237 = vector.load %arg3[%c19, %c0_151, %c0_152] : memref<27x1x256xf32, #tpu.memory_space<vmem>>, vector<1x1x256xf32>
    %238 = vector.shape_cast %237 : vector<1x1x256xf32> to vector<1x256xf32>
    %239 = vector.broadcast %238 : vector<1x256xf32> to vector<8x256xf32>
    %240 = arith.mulf %236, %239 : vector<8x256xf32>
    %c19_153 = arith.constant 19 : index
    %c0_154 = arith.constant 0 : index
    %c0_155 = arith.constant 0 : index
    %241 = vector.load %arg8[%c19_153, %c0_154, %c0_155] : memref<27x8x8xbf16, #tpu.memory_space<vmem>>, vector<1x8x8xbf16>
    %242 = vector.shape_cast %241 : vector<1x8x8xbf16> to vector<8x8xbf16>
    %243 = arith.truncf %240 : vector<8x256xf32> to vector<8x256xbf16>
    %cst_156 = arith.constant dense<0.000000e+00> : vector<8x256xf32>
    %244 = tpu.matmul %242, %243, %cst_156 {dimension_numbers = #tpu.dot_dimension_numbers<[1], [0], [0], [1], [0, 0, 1, 1], [], []>} : vector<8x8xbf16>, vector<8x256xbf16>, vector<8x256xf32> -> vector<8x256xf32>
    %245 = arith.addf %235, %244 : vector<8x256xf32>
    %c105_i32 = arith.constant 105 : i32
    %246 = tpu.dynamic_rotate %224 by %c105_i32 dim 1 : vector<8x256xf32>, i32 -> vector<8x256xf32>
    %c20 = arith.constant 20 : index
    %c0_157 = arith.constant 0 : index
    %c0_158 = arith.constant 0 : index
    %247 = vector.load %arg3[%c20, %c0_157, %c0_158] : memref<27x1x256xf32, #tpu.memory_space<vmem>>, vector<1x1x256xf32>
    %248 = vector.shape_cast %247 : vector<1x1x256xf32> to vector<1x256xf32>
    %249 = vector.broadcast %248 : vector<1x256xf32> to vector<8x256xf32>
    %250 = arith.mulf %246, %249 : vector<8x256xf32>
    %c20_159 = arith.constant 20 : index
    %c0_160 = arith.constant 0 : index
    %c0_161 = arith.constant 0 : index
    %251 = vector.load %arg8[%c20_159, %c0_160, %c0_161] : memref<27x8x8xbf16, #tpu.memory_space<vmem>>, vector<1x8x8xbf16>
    %252 = vector.shape_cast %251 : vector<1x8x8xbf16> to vector<8x8xbf16>
    %253 = arith.truncf %250 : vector<8x256xf32> to vector<8x256xbf16>
    %cst_162 = arith.constant dense<0.000000e+00> : vector<8x256xf32>
    %254 = tpu.matmul %252, %253, %cst_162 {dimension_numbers = #tpu.dot_dimension_numbers<[1], [0], [0], [1], [0, 0, 1, 1], [], []>} : vector<8x8xbf16>, vector<8x256xbf16>, vector<8x256xf32> -> vector<8x256xf32>
    %255 = arith.addf %245, %254 : vector<8x256xf32>
    %c7_i32 = arith.constant 7 : i32
    %256 = tpu.dynamic_rotate %224 by %c7_i32 dim 1 : vector<8x256xf32>, i32 -> vector<8x256xf32>
    %c21 = arith.constant 21 : index
    %c0_163 = arith.constant 0 : index
    %c0_164 = arith.constant 0 : index
    %257 = vector.load %arg3[%c21, %c0_163, %c0_164] : memref<27x1x256xf32, #tpu.memory_space<vmem>>, vector<1x1x256xf32>
    %258 = vector.shape_cast %257 : vector<1x1x256xf32> to vector<1x256xf32>
    %259 = vector.broadcast %258 : vector<1x256xf32> to vector<8x256xf32>
    %260 = arith.mulf %256, %259 : vector<8x256xf32>
    %c21_165 = arith.constant 21 : index
    %c0_166 = arith.constant 0 : index
    %c0_167 = arith.constant 0 : index
    %261 = vector.load %arg8[%c21_165, %c0_166, %c0_167] : memref<27x8x8xbf16, #tpu.memory_space<vmem>>, vector<1x8x8xbf16>
    %262 = vector.shape_cast %261 : vector<1x8x8xbf16> to vector<8x8xbf16>
    %263 = arith.truncf %260 : vector<8x256xf32> to vector<8x256xbf16>
    %cst_168 = arith.constant dense<0.000000e+00> : vector<8x256xf32>
    %264 = tpu.matmul %262, %263, %cst_168 {dimension_numbers = #tpu.dot_dimension_numbers<[1], [0], [0], [1], [0, 0, 1, 1], [], []>} : vector<8x8xbf16>, vector<8x256xbf16>, vector<8x256xf32> -> vector<8x256xf32>
    %265 = arith.addf %255, %264 : vector<8x256xf32>
    %c22 = arith.constant 22 : index
    %c0_169 = arith.constant 0 : index
    %c0_170 = arith.constant 0 : index
    %266 = vector.load %arg8[%c22, %c0_169, %c0_170] : memref<27x8x8xbf16, #tpu.memory_space<vmem>>, vector<1x8x8xbf16>
    %267 = vector.shape_cast %266 : vector<1x8x8xbf16> to vector<8x8xbf16>
    %268 = arith.truncf %224 : vector<8x256xf32> to vector<8x256xbf16>
    %cst_171 = arith.constant dense<0.000000e+00> : vector<8x256xf32>
    %269 = tpu.matmul %267, %268, %cst_171 {dimension_numbers = #tpu.dot_dimension_numbers<[1], [0], [0], [1], [0, 0, 1, 1], [], []>} : vector<8x8xbf16>, vector<8x256xbf16>, vector<8x256xf32> -> vector<8x256xf32>
    %270 = arith.addf %265, %269 : vector<8x256xf32>
    %c249_i32 = arith.constant 249 : i32
    %271 = tpu.dynamic_rotate %224 by %c249_i32 dim 1 : vector<8x256xf32>, i32 -> vector<8x256xf32>
    %c23 = arith.constant 23 : index
    %c0_172 = arith.constant 0 : index
    %c0_173 = arith.constant 0 : index
    %272 = vector.load %arg3[%c23, %c0_172, %c0_173] : memref<27x1x256xf32, #tpu.memory_space<vmem>>, vector<1x1x256xf32>
    %273 = vector.shape_cast %272 : vector<1x1x256xf32> to vector<1x256xf32>
    %274 = vector.broadcast %273 : vector<1x256xf32> to vector<8x256xf32>
    %275 = arith.mulf %271, %274 : vector<8x256xf32>
    %c23_174 = arith.constant 23 : index
    %c0_175 = arith.constant 0 : index
    %c0_176 = arith.constant 0 : index
    %276 = vector.load %arg8[%c23_174, %c0_175, %c0_176] : memref<27x8x8xbf16, #tpu.memory_space<vmem>>, vector<1x8x8xbf16>
    %277 = vector.shape_cast %276 : vector<1x8x8xbf16> to vector<8x8xbf16>
    %278 = arith.truncf %275 : vector<8x256xf32> to vector<8x256xbf16>
    %cst_177 = arith.constant dense<0.000000e+00> : vector<8x256xf32>
    %279 = tpu.matmul %277, %278, %cst_177 {dimension_numbers = #tpu.dot_dimension_numbers<[1], [0], [0], [1], [0, 0, 1, 1], [], []>} : vector<8x8xbf16>, vector<8x256xbf16>, vector<8x256xf32> -> vector<8x256xf32>
    %280 = arith.addf %270, %279 : vector<8x256xf32>
    %c151_i32 = arith.constant 151 : i32
    %281 = tpu.dynamic_rotate %224 by %c151_i32 dim 1 : vector<8x256xf32>, i32 -> vector<8x256xf32>
    %c24 = arith.constant 24 : index
    %c0_178 = arith.constant 0 : index
    %c0_179 = arith.constant 0 : index
    %282 = vector.load %arg3[%c24, %c0_178, %c0_179] : memref<27x1x256xf32, #tpu.memory_space<vmem>>, vector<1x1x256xf32>
    %283 = vector.shape_cast %282 : vector<1x1x256xf32> to vector<1x256xf32>
    %284 = vector.broadcast %283 : vector<1x256xf32> to vector<8x256xf32>
    %285 = arith.mulf %281, %284 : vector<8x256xf32>
    %c24_180 = arith.constant 24 : index
    %c0_181 = arith.constant 0 : index
    %c0_182 = arith.constant 0 : index
    %286 = vector.load %arg8[%c24_180, %c0_181, %c0_182] : memref<27x8x8xbf16, #tpu.memory_space<vmem>>, vector<1x8x8xbf16>
    %287 = vector.shape_cast %286 : vector<1x8x8xbf16> to vector<8x8xbf16>
    %288 = arith.truncf %285 : vector<8x256xf32> to vector<8x256xbf16>
    %cst_183 = arith.constant dense<0.000000e+00> : vector<8x256xf32>
    %289 = tpu.matmul %287, %288, %cst_183 {dimension_numbers = #tpu.dot_dimension_numbers<[1], [0], [0], [1], [0, 0, 1, 1], [], []>} : vector<8x8xbf16>, vector<8x256xbf16>, vector<8x256xf32> -> vector<8x256xf32>
    %290 = arith.addf %280, %289 : vector<8x256xf32>
    %c144_i32 = arith.constant 144 : i32
    %291 = tpu.dynamic_rotate %224 by %c144_i32 dim 1 : vector<8x256xf32>, i32 -> vector<8x256xf32>
    %c25 = arith.constant 25 : index
    %c0_184 = arith.constant 0 : index
    %c0_185 = arith.constant 0 : index
    %292 = vector.load %arg3[%c25, %c0_184, %c0_185] : memref<27x1x256xf32, #tpu.memory_space<vmem>>, vector<1x1x256xf32>
    %293 = vector.shape_cast %292 : vector<1x1x256xf32> to vector<1x256xf32>
    %294 = vector.broadcast %293 : vector<1x256xf32> to vector<8x256xf32>
    %295 = arith.mulf %291, %294 : vector<8x256xf32>
    %c25_186 = arith.constant 25 : index
    %c0_187 = arith.constant 0 : index
    %c0_188 = arith.constant 0 : index
    %296 = vector.load %arg8[%c25_186, %c0_187, %c0_188] : memref<27x8x8xbf16, #tpu.memory_space<vmem>>, vector<1x8x8xbf16>
    %297 = vector.shape_cast %296 : vector<1x8x8xbf16> to vector<8x8xbf16>
    %298 = arith.truncf %295 : vector<8x256xf32> to vector<8x256xbf16>
    %cst_189 = arith.constant dense<0.000000e+00> : vector<8x256xf32>
    %299 = tpu.matmul %297, %298, %cst_189 {dimension_numbers = #tpu.dot_dimension_numbers<[1], [0], [0], [1], [0, 0, 1, 1], [], []>} : vector<8x8xbf16>, vector<8x256xbf16>, vector<8x256xf32> -> vector<8x256xf32>
    %300 = arith.addf %290, %299 : vector<8x256xf32>
    %c137_i32 = arith.constant 137 : i32
    %301 = tpu.dynamic_rotate %224 by %c137_i32 dim 1 : vector<8x256xf32>, i32 -> vector<8x256xf32>
    %c26 = arith.constant 26 : index
    %c0_190 = arith.constant 0 : index
    %c0_191 = arith.constant 0 : index
    %302 = vector.load %arg3[%c26, %c0_190, %c0_191] : memref<27x1x256xf32, #tpu.memory_space<vmem>>, vector<1x1x256xf32>
    %303 = vector.shape_cast %302 : vector<1x1x256xf32> to vector<1x256xf32>
    %304 = vector.broadcast %303 : vector<1x256xf32> to vector<8x256xf32>
    %305 = arith.mulf %301, %304 : vector<8x256xf32>
    %c26_192 = arith.constant 26 : index
    %c0_193 = arith.constant 0 : index
    %c0_194 = arith.constant 0 : index
    %306 = vector.load %arg8[%c26_192, %c0_193, %c0_194] : memref<27x8x8xbf16, #tpu.memory_space<vmem>>, vector<1x8x8xbf16>
    %307 = vector.shape_cast %306 : vector<1x8x8xbf16> to vector<8x8xbf16>
    %308 = arith.truncf %305 : vector<8x256xf32> to vector<8x256xbf16>
    %cst_195 = arith.constant dense<0.000000e+00> : vector<8x256xf32>
    %309 = tpu.matmul %307, %308, %cst_195 {dimension_numbers = #tpu.dot_dimension_numbers<[1], [0], [0], [1], [0, 0, 1, 1], [], []>} : vector<8x8xbf16>, vector<8x256xbf16>, vector<8x256xf32> -> vector<8x256xf32>
    %310 = arith.addf %300, %309 : vector<8x256xf32>
    %c2_196 = arith.constant 2 : index
    %c0_197 = arith.constant 0 : index
    %c0_198 = arith.constant 0 : index
    %311 = vector.load %arg9[%c2_196, %c0_197, %c0_198] : memref<3x8x1xf32, #tpu.memory_space<vmem>>, vector<1x8x1xf32>
    %312 = vector.shape_cast %311 : vector<1x8x1xf32> to vector<8x1xf32>
    %313 = vector.broadcast %312 : vector<8x1xf32> to vector<8x256xf32>
    %314 = arith.addf %310, %313 : vector<8x256xf32>
    %cst_199 = arith.constant 0.000000e+00 : f32
    %315 = vector.broadcast %cst_199 : f32 to vector<8x256xf32>
    %316 = arith.maximumf %314, %315 : vector<8x256xf32>
    %c0_200 = arith.constant 0 : index
    %c0_201 = arith.constant 0 : index
    %c0_202 = arith.constant 0 : index
    %317 = vector.load %arg2[%c0_200, %c0_201, %c0_202] : memref<1x8x256xbf16, #tpu.memory_space<vmem>>, vector<1x8x256xbf16>
    %318 = vector.shape_cast %317 : vector<1x8x256xbf16> to vector<8x256xbf16>
    %319 = arith.extf %318 : vector<8x256xbf16> to vector<8x256xf32>
    %320 = tpu.concatenate %10, %112, %214, %316, %9, %319 in 0 : vector<8x256xf32>, vector<8x256xf32>, vector<8x256xf32>, vector<8x256xf32>, vector<8x256xf32>, vector<8x256xf32> -> vector<48x256xf32>
    %c0_203 = arith.constant 0 : index
    %c0_204 = arith.constant 0 : index
    %321 = vector.load %arg10[%c0_203, %c0_204] : memref<32x48xbf16, #tpu.memory_space<vmem>>, vector<32x48xbf16>
    %322 = arith.truncf %320 : vector<48x256xf32> to vector<48x256xbf16>
    %cst_205 = arith.constant dense<0.000000e+00> : vector<32x256xf32>
    %323 = tpu.matmul %321, %322, %cst_205 {dimension_numbers = #tpu.dot_dimension_numbers<[1], [0], [0], [1], [0, 0, 1, 1], [], []>} : vector<32x48xbf16>, vector<48x256xbf16>, vector<32x256xf32> -> vector<32x256xf32>
    %c0_206 = arith.constant 0 : index
    %c0_207 = arith.constant 0 : index
    %324 = vector.load %arg11[%c0_206, %c0_207] : memref<32x1xf32, #tpu.memory_space<vmem>>, vector<32x1xf32>
    %325 = vector.broadcast %324 : vector<32x1xf32> to vector<32x256xf32>
    %326 = arith.addf %323, %325 : vector<32x256xf32>
    %327 = arith.extf %1 : vector<32x256xbf16> to vector<32x256xf32>
    %328 = arith.addf %326, %327 : vector<32x256xf32>
    %cst_208 = arith.constant 0.000000e+00 : f32
    %329 = vector.broadcast %cst_208 : f32 to vector<32x256xf32>
    %330 = arith.maximumf %328, %329 : vector<32x256xf32>
    %c0_209 = arith.constant 0 : index
    %c0_210 = arith.constant 0 : index
    %c0_211 = arith.constant 0 : index
    %331 = vector.load %arg12[%c0_209, %c0_210, %c0_211] : memref<1x32x256xf32, #tpu.memory_space<vmem>>, vector<1x32x256xf32>
    %332 = vector.shape_cast %331 : vector<1x32x256xf32> to vector<32x256xf32>
    %333 = vector.shape_cast %330 : vector<32x256xf32> to vector<1x32x256xf32>
    tpu.vector_store %arg12[%c0_209, %c0_210, %c0_211], %333 {strides = array<i32>} : memref<1x32x256xf32, #tpu.memory_space<vmem>>, vector<1x32x256xf32>,
    return
  }
  func.func @transform_0(%arg0: i32) -> (i32, i32, i32) {
    %c0_i32 = arith.constant 0 : i32
    %c0_i32_0 = arith.constant 0 : i32
    %c0_i32_1 = arith.constant 0 : i32
    return %arg0, %c0_i32, %c0_i32_0 : i32, i32, i32
  }
  func.func @transform_1(%arg0: i32) -> (i32, i32, i32) {
    %c0_i32 = arith.constant 0 : i32
    %c0_i32_0 = arith.constant 0 : i32
    %c0_i32_1 = arith.constant 0 : i32
    return %arg0, %c0_i32, %c0_i32_0 : i32, i32, i32
  }
  func.func @transform_2(%arg0: i32) -> (i32, i32, i32) {
    %c0_i32 = arith.constant 0 : i32
    %c0_i32_0 = arith.constant 0 : i32
    %c0_i32_1 = arith.constant 0 : i32
    %c0_i32_2 = arith.constant 0 : i32
    return %c0_i32, %c0_i32_0, %c0_i32_1 : i32, i32, i32
  }
  func.func @transform_3(%arg0: i32) -> (i32, i32) {
    %c0_i32 = arith.constant 0 : i32
    %c0_i32_0 = arith.constant 0 : i32
    %c0_i32_1 = arith.constant 0 : i32
    return %c0_i32, %c0_i32_0 : i32, i32
  }
  func.func @transform_4(%arg0: i32) -> (i32, i32) {
    %c0_i32 = arith.constant 0 : i32
    %c0_i32_0 = arith.constant 0 : i32
    %c0_i32_1 = arith.constant 0 : i32
    return %c0_i32, %c0_i32_0 : i32, i32
  }
  func.func @transform_5(%arg0: i32) -> (i32, i32, i32) {
    %c0_i32 = arith.constant 0 : i32
    %c0_i32_0 = arith.constant 0 : i32
    %c0_i32_1 = arith.constant 0 : i32
    %c0_i32_2 = arith.constant 0 : i32
    return %c0_i32, %c0_i32_0, %c0_i32_1 : i32, i32, i32
  }
  func.func @transform_6(%arg0: i32) -> (i32, i32, i32) {
    %c0_i32 = arith.constant 0 : i32
    %c0_i32_0 = arith.constant 0 : i32
    %c0_i32_1 = arith.constant 0 : i32
    %c0_i32_2 = arith.constant 0 : i32
    return %c0_i32, %c0_i32_0, %c0_i32_1 : i32, i32, i32
  }
  func.func @transform_7(%arg0: i32) -> (i32, i32, i32) {
    %c0_i32 = arith.constant 0 : i32
    %c0_i32_0 = arith.constant 0 : i32
    %c0_i32_1 = arith.constant 0 : i32
    %c0_i32_2 = arith.constant 0 : i32
    return %c0_i32, %c0_i32_0, %c0_i32_1 : i32, i32, i32
  }
  func.func @transform_8(%arg0: i32) -> (i32, i32, i32) {
    %c0_i32 = arith.constant 0 : i32
    %c0_i32_0 = arith.constant 0 : i32
    %c0_i32_1 = arith.constant 0 : i32
    %c0_i32_2 = arith.constant 0 : i32
    return %c0_i32, %c0_i32_0, %c0_i32_1 : i32, i32, i32
  }
  func.func @transform_9(%arg0: i32) -> (i32, i32) {
    %c0_i32 = arith.constant 0 : i32
    %c0_i32_0 = arith.constant 0 : i32
    %c0_i32_1 = arith.constant 0 : i32
    return %c0_i32, %c0_i32_0 : i32, i32
  }
  func.func @transform_10(%arg0: i32) -> (i32, i32) {
    %c0_i32 = arith.constant 0 : i32
    %c0_i32_0 = arith.constant 0 : i32
    %c0_i32_1 = arith.constant 0 : i32
    return %c0_i32, %c0_i32_0 : i32, i32
  }
  func.func @transform_11(%arg0: i32) -> (i32, i32, i32) {
    %c0_i32 = arith.constant 0 : i32
    %c0_i32_0 = arith.constant 0 : i32
    %c0_i32_1 = arith.constant 0 : i32
    return %arg0, %c0_i32, %c0_i32_0 : i32, i32, i32
  }
}

</mosaic_0001>

<bundles_post_ra>
// kernel: dcspm_forward.1
= control target key start
LH: loop header
LB: loop body
LE: loop exit
PB: predicated region body
PF: predicated region fallthrough
CT: control target
= control target key end

     0   :  { %s2628_s17 = smov 0   ;;  %s3176_s0 = inlined_call_operand.vmem [shape: bf16[2,32,256], index: 0, kind: input, shape index: {}]   ;;  %s3177_s1 = inlined_call_operand.vmem [shape: bf16[2,8,256], index: 1, kind: input, shape index: {}]   ;;  %s3178_s2 = inlined_call_operand.vmem [shape: f32[27,1,256], index: 2, kind: input, shape index: {}]   ;;  %s3179_s3 = inlined_call_operand.vmem [shape: bf16[16,32], index: 3, kind: input, shape index: {}]   ;;  %s3180_s4 = inlined_call_operand.vmem [shape: f32[16,1], index: 4, kind: input, shape index: {}]   ;;  %s3181_s5 = inlined_call_operand.vmem [shape: bf16[3,8,8], index: 5, kind: input, shape index: {}]   ;;  %s3182_s6 = inlined_call_operand.vmem [shape: f32[3,8,1], index: 6, kind: input, shape index: {}]   ;;  %s3183_s7 = inlined_call_operand.vmem [shape: bf16[27,8,8], index: 7, kind: input, shape index: {}]   ;;  %s3184_s8 = inlined_call_operand.vmem [shape: f32[3,8,1], index: 8, kind: input, shape index: {}]   ;;  %s3185_s9 = inlined_call_operand.vmem [shape: bf16[32,48], index: 9, kind: input, shape index: {}]   ;;  %s3186_s10 = inlined_call_operand.vmem [shape: f32[32,1], index: 10, kind: input, shape index: {}]   ;;  %s3187_s11 = inlined_call_operand.vmem [shape: f32[2,32,256], index: 11, kind: output, shape index: {}]  }
   0x1 LB: > { %s2331_s18 = sadd.s32 4294967295, %s2543_s17   ;;  %p2335_p0 = scmp.ge.s32.totalorder %s2543_s17, 1  ;;  %s2543_s17 = sphi %s2628_s17, %s21_s17  }
   0x2   : > { %p347_p1 = scmp.lt.s32.totalorder %s2543_s17, 3 }
   0x4   : > { %p348_p2 = pnand %p2335_p0, %p347_p1 }
   0x5   : > { %p392_p3 = scmp.lt.s32.totalorder (!%p348_p2), %s2331_s18, 1  ;;  %s2546_s12 = smov (!%p348_p2), 45  }
   0x6   : > { %351 = sbr.rel (%p348_p2) target bundleno = 1748 (0x6d4), region = 64  ;;  %s2547_s13 = smov (!%p348_p2), 51  }
   0x7   : > { %s2548_s14 = smov (!%p348_p2), 48   ;;  %s2549_s15 = smov (!%p348_p2), 3  }
   0x8   : > { %s2550_s16 = smov (!%p348_p2), 125   ;;  %s2551_s19 = smov (!%p348_p2), 77  }
   0x9   : > { %s2552_s20 = smov (!%p348_p2), 83   ;;  %s2553_s23 = smov (!%p348_p2), 80  }
   0xa   : > { %s2557_s22 = smov (!%p348_p2), 5   ;;  %s2558_s25 = smov (!%p348_p2), 123  }
   0xb   : > { %v415_v0 = vld [vmem:[%s3180_s4 + $0x8] sm:$0xff]  ;;  %v2545_v1 = vmov 0   ;;  %s3189_s18 = smov (!%p392_p3, %s2331_s18), 1  ;;  %v490_v2 = vld [vmem:[%s3182_s6] sm:$0xff]  ;;  %vm451_vm0 = vcmask 261120   ;;  %vm500_vm1 = vcmask 1043456   ;;  %v539_v41 = vlaneseq }
   0xc   : > { %2534 = vset.pattern.permute.xlu0 %v2545_v1  ;;  %2535 = vset.pattern.permute.xlu1 %v2545_v1  ;;  %s2493_s21 = sshll.u32 %s3189_s18, 5  ;;  %v2500_v15 = vld [vmem:[%s3179_s3] sm:$0xff]  ;;  %vm496_vm2 = vcmask 64512   ;;  %s2494_s26 = sshll.u32 %s3189_s18, 3 }
   0xd   : > { %423 = vperm.xlu0 %2534, %v415_v0   ;;  %2536 = vset.pattern.permute.xlu2 %v2545_v1  ;;  %s2645_s24 = scalar_lea.vmem %s3176_s0, %s2493_s21  ;;  %v487_v29 = vld [vmem:[%s3181_s5] sm:$0xf]  ;;  %v2707_v42 = vand.u32 127, %v539_v41  ;;  %v2376_v47 = vld [vmem:[%s3178_s2 + $0x6] sm:$0x3]  ;;  %s2556_s21 = smov 53  }
   0xe   : > { %v2356_v3 = vld [vmem:[%s2645_s24 + $0x10] sm:$0xf]  ;;  %v2499_v4 = vld [vmem:[%s2645_s24 + $0x14] sm:$0xf0]  ;;  %v2498_v5 = vld [vmem:[%s2645_s24 + $0x14] sm:$0xf]  ;;  %s401_s29 = scalar_lea.vmem %s3177_s1, %s2494_s26 }
   0xf   : > { %v2357_v6 = vor.u32 %v2499_v4, %v2356_v3  ;;  %v2358_v7 = vld [vmem:[%s2645_s24 + $0x18] sm:$0xf0]  ;;  %v2348_v8 = vld [vmem:[%s2645_s24] sm:$0xf]  ;;  %v2497_v9 = vld [vmem:[%s2645_s24 + $0x4] sm:$0xf0] }
  0x10   : > { %v2361_v10 = vor.u32 %v2498_v5, %v2358_v7  ;;  %v2496_v11 = vld [vmem:[%s2645_s24 + $0x4] sm:$0xf]  ;;  %v2350_v12 = vld [vmem:[%s2645_s24 + $0x8] sm:$0xf0]  ;;  %v2349_v13 = vor.u32 %v2497_v9, %v2348_v8  ;;  %v544_v45 = vld [vmem:[%s3178_s2] sm:$0x3] }
  0x11   : > { %461 = vmatpush.bf16.msra.mxu0 %v2357_v6  ;;  %v2353_v14 = vor.u32 %v2496_v11, %v2350_v12  ;;  %v1028_v39 = vld [vmem:[%s3184_s8] sm:$0xff]  ;;  %vm541_vm3 = vcmp.lt.s32.totalorder %v2707_v42, 51  ;;  %v546_v48 = vperm.slane %v544_v45, 0  ;;  %v547_v49 = vperm.slane %v544_v45, 1 }
  0x12   : > { %475 = vmatpush.bf16.msra.mxu1 %v2361_v10  ;;  %v2366_v50 = vld [vmem:[%s3178_s2 + $0x2] sm:$0x3]  ;;  %vm706_vm4 = vcmp.lt.s32.totalorder %v2707_v42, 3  ;;  %v712_v53 = vperm.slane %v2376_v47, 0  ;;  %v713_v54 = vperm.slane %v2376_v47, 1  ;;  %vm559_vm5 = vcmp.lt.s32.totalorder %v2707_v42, 48 }
  0x13   : > { %v565_v55 = vperm.slane %v2366_v50, 0  ;;  %v566_v56 = vperm.slane %v2366_v50, 1  ;;  %v2372_v10 = vld [vmem:[%s3178_s2 + $0x4] sm:$0x3]  ;;  %vm649_vm6 = vcmp.lt.s32.totalorder %v2707_v42, 45  ;;  %vm804_vm7 = vcmp.lt.s32.totalorder %v2707_v42, 125 }
  0x14   : > { %v552_v47 = vld [vmem:[%s3183_s7] sm:$0xf]  ;;  %vm861_vm8 = vcmp.lt.s32.totalorder %v2707_v42, 83  ;;  %vm918_vm9 = vcmp.lt.s32.totalorder %v2707_v42, 80  ;;  %vm975_vm10 = vcmp.lt.s32.totalorder %v2707_v42, 77  ;;  %vm1199_vm11 = vcmp.lt.s32.totalorder %v2707_v42, 75 }
  0x15   : > { %493 = vperm.xlu0 %2534, %v490_v2   ;;  %462 = vmatpush.bf16.msra.mxu0 %v2349_v13  ;;  %vm1090_vm12 = vcmp.lt.s32.totalorder %v2707_v42, 85  ;;  %vm1411_vm13 = vcmp.lt.s32.totalorder %v2707_v42, 53  ;;  %vm1256_vm14 = vcmp.lt.s32.totalorder %v2707_v42, 5  ;;  %vm1354_vm15 = vcmp.lt.s32.totalorder %v2707_v42, 123 }
  0x16   : > { %476 = vmatpush.bf16.msra.mxu1 %v2353_v14 }
  0x18   : > { %2362 = vmatmul.msk.bf16.vlgmr.msra.gmra.mxu0 %vm451_vm0, %v2500_v15 }
  0x19   : > { %2363 = vmatmul.msk.bf16.vlgmr.msra.gmra.mxu1 %vm451_vm0, %v2500_v15  ;;  %vm1524_vm0 = vcmp.lt.s32.totalorder %v2707_v42, 43 }
  0x7f   : > { %v424_v18 = vpop.permute.xlu0 %423 }
  0x87   : > { %v494_v30 = vpop.permute.xlu0 %493 }
  0x95   : > { %v2661_v16 = vpop.f32.mrf.mxu0 }
  0x96   : > { %v2663_v17 = vpop.f32.mrf.mxu1 }
  0x9d   : > { %v466_v19 = vpop.f32.mrf.mxu0 }
  0x9e   : > { %v467_v20 = vadd.f32 %v466_v19, %v424_v18  ;;  %v480_v21 = vpop.f32.mrf.mxu1  ;;  %v655_v19 = vperm.slane %v2372_v10, 0 }
  0x9f   : > { %v481_v22 = vadd.f32 %v480_v21, %v424_v18  ;;  %v2377_v21 = vld [vmem:[%s3183_s7 + $0xc] sm:$0xf] }
  0xa0   : > { %v2665_v23 = vmax.f32 %v467_v20, 0.0  ;;  %v656_v20 = vperm.slane %v2372_v10, 1 }
  0xa1   : > { %v2667_v24 = vmax.f32 %v481_v22, 0.0 }
  0xa2   : > { %v488_v25 = vpack.c.bf16 %v2665_v23, %v2665_v23 }
  0xa3   : > { %v489_v26 = vpack.c.bf16 %v2667_v24, %v2667_v24 }
  0xa4   : > { %v502_v27 = vsel %vm500_vm1, %v488_v25, 0 }
  0xa5   : > { %514 = vmatpush.bf16.msra.mxu2 %v502_v27  ;;  %v505_v28 = vsel %vm500_vm1, %v489_v26, 0  ;;  %v2367_v26 = vld [vmem:[%s3183_s7 + $0x4] sm:$0xf] }
  0xa6   : > { %527 = vmatpush.bf16.msra.mxu3 %v505_v28 }
  0xa8   : > { %2364 = vmatmul.msk.bf16.vlgmr.msra.gmra.mxu2 %vm496_vm2, %v487_v29 }
  0xa9   : > { %2365 = vmatmul.msk.bf16.vlgmr.msra.gmra.mxu3 %vm496_vm2, %v487_v29 }
 0x12b   : > { %v516_v31 = vpop.f32.mrf.mxu2 }
 0x12c   : > { %v517_v32 = vadd.f32 %v516_v31, %v494_v30  ;;  %v529_v33 = vpop.f32.mrf.mxu3 }
 0x12d   : > { %v530_v35 = vadd.f32 %v529_v33, %v494_v30 }
 0x12e   : > { %v2680_v34 = vmax.f32 %v517_v32, 0.0 }
 0x12f   : > { %v2686_v38 = vmax.f32 %v530_v35, 0.0 }
 0x130   : > { %645 = vrot.lane.b32.xlu0 %v2680_v34, %s2546_s12  ;;  %535 = vrot.lane.b32.xlu2 %v2680_v34, %s2547_s13  ;;  %v761_v41 = vpack.c.bf16 %v2680_v34, %v2680_v34 }
 0x131   : > { %555 = vrot.lane.b32.xlu1 %v2680_v34, %s2548_s14 }
 0x133   : > { %v518_v36 = vpop.f32.mrf.mxu2 }
 0x134   : > { %v531_v37 = vpop.f32.mrf.mxu3 }
 0x138   : > { %704 = vrot.lane.b32.xlu0 %v2686_v38, %s2549_s15  ;;  %537 = vrot.lane.b32.xlu2 %v2686_v38, %s2547_s13  ;;  %s2495_s13 = sshll.u32 %s3189_s18, 6 }
 0x139   : > { %557 = vrot.lane.b32.xlu1 %v2686_v38, %s2548_s14 }
 0x140   : > { %800 = vrot.lane.b32.xlu0 %v2680_v34, %s2550_s16  ;;  %702 = vrot.lane.b32.xlu2 %v2680_v34, %s2549_s15 }
 0x141   : > { %647 = vrot.lane.b32.xlu1 %v2686_v38, %s2546_s12 }
 0x148   : > { %973 = vrot.lane.b32.xlu0 %v2686_v38, %s2551_s19  ;;  %859 = vrot.lane.b32.xlu2 %v2686_v38, %s2552_s20 }
 0x149   : > { %857 = vrot.lane.b32.xlu1 %v2680_v34, %s2552_s20  ;;  %s2555_s20 = smov 85  }
 0x150   : > { %1031 = vperm.xlu0 %2534, %v1028_v39   ;;  %971 = vrot.lane.b32.xlu2 %v2680_v34, %s2551_s19  ;;  %s2554_s19 = smov 75  }
 0x151   : > { %802 = vrot.lane.b32.xlu1 %v2686_v38, %s2550_s16  ;;  %s2561_s16 = smov 112  }
 0x158   : > { %916 = vrot.lane.b32.xlu2 %v2686_v38, %s2553_s23 }
 0x159   : > { %914 = vrot.lane.b32.xlu1 %v2680_v34, %s2553_s23  ;;  %v2387_v34 = vld [vmem:[%s3178_s2 + $0xc] sm:$0x3] }
 0x18a   : > { %v536_v40 = vpop.permute.xlu2 %535 }
 0x192   : > { %v538_v43 = vpop.permute.xlu2 %537 }
 0x193   : > { %v542_v51 = vsel %vm541_vm3, %v536_v40, %v538_v43  ;;  %v543_v52 = vsel %vm541_vm3, %v538_v43, %v536_v40  ;;  %v2383_v40 = vld [vmem:[%s3178_s2 + $0xa] sm:$0x3]  ;;  %vm1750_vm3 = vcmp.lt.s32.totalorder %v2707_v42, 105 }
 0x194   : > { %v550_v57 = vmul.f32 %v546_v48, %v543_v52  ;;  %v551_v58 = vmul.f32 %v547_v49, %v542_v51  ;;  %v811_v45 = vperm.slane %v2383_v40, 1 }
 0x196   : > { %v553_v6 = vpack.c.bf16 %v550_v57, %v550_v57  ;;  %v554_v7 = vpack.c.bf16 %v551_v58, %v551_v58  ;;  %v867_v58 = vperm.slane %v2387_v34, 0 }
 0x198   : > { %v614_v22 = vsel %vm500_vm1, %v553_v6, 0  ;;  %v617_v25 = vsel %vm500_vm1, %v554_v7, 0 }
 0x19a   : > { %v703_v59 = vpop.permute.xlu2 %702 }
 0x1a2   : > { %v646_v44 = vpop.permute.xlu0 %645  ;;  %v860_v32 = vpop.permute.xlu2 %859 }
 0x1a3   : > { %v556_v46 = vpop.permute.xlu1 %555 }
 0x1aa   : > { %v705_v60 = vpop.permute.xlu0 %704  ;;  %v2756_v43 = vpop.permute.xlu2 %971 }
 0x1ab   : > { %v707_v61 = vsel %vm706_vm4, %v703_v59, %v705_v60  ;;  %v708_v62 = vsel %vm706_vm4, %v705_v60, %v703_v59  ;;  %v558_v63 = vpop.permute.xlu1 %557  ;;  %v868_v59 = vperm.slane %v2387_v34, 1  ;;  %vm1660_vm4 = vcmp.lt.s32.totalorder %v2707_v42, 112 }
 0x1ac   : > { %v716_v0 = vmul.f32 %v712_v53, %v708_v62  ;;  %v717_v1 = vmul.f32 %v713_v54, %v707_v61  ;;  %v560_v2 = vsel %vm559_vm5, %v556_v46, %v558_v63  ;;  %v561_v3 = vsel %vm559_vm5, %v558_v63, %v556_v46 }
 0x1ad   : > { %v569_v4 = vmul.f32 %v565_v55, %v561_v3  ;;  %v570_v5 = vmul.f32 %v566_v56, %v560_v2  ;;  %v762_v46 = vpack.c.bf16 %v2686_v38, %v2686_v38  ;;  %v767_v38 = vsel %vm500_vm1, %v761_v41, 0  ;;  %v2391_v55 = vld [vmem:[%s3178_s2 + $0xe] sm:$0x3]  ;;  %v2384_v2 = vld [vmem:[%s3183_s7 + $0x14] sm:$0xf] }
 0x1ae   : > { %v720_v8 = vpack.c.bf16 %v716_v0, %v716_v0  ;;  %v721_v9 = vpack.c.bf16 %v717_v1, %v717_v1  ;;  %v924_v60 = vperm.slane %v2391_v55, 0  ;;  %v925_v0 = vperm.slane %v2391_v55, 1  ;;  %v2396_v41 = vld [vmem:[%s3183_s7 + $0x20] sm:$0xf] }
 0x1af   : > { %v573_v11 = vpack.c.bf16 %v569_v4, %v569_v4  ;;  %v574_v12 = vpack.c.bf16 %v570_v5, %v570_v5  ;;  %v770_v54 = vsel %vm500_vm1, %v762_v46, 0 }
 0x1b0   : > { %v726_v13 = vsel %vm500_vm1, %v720_v8, 0  ;;  %v729_v14 = vsel %vm500_vm1, %v721_v9, 0 }
 0x1b1   : > { %v579_v15 = vsel %vm500_vm1, %v573_v11, 0  ;;  %v582_v18 = vsel %vm500_vm1, %v574_v12, 0  ;;  %738 = vmatpush.bf16.msrb.mxu0 %v726_v13  ;;  %751 = vmatpush.bf16.msrb.mxu1 %v729_v14 }
 0x1b2   : > { %591 = vmatpush.bf16.msrb.mxu2 %v579_v15  ;;  %604 = vmatpush.bf16.msrb.mxu3 %v582_v18  ;;  %v801_v48 = vpop.permute.xlu0 %800  ;;  %v917_v3 = vpop.permute.xlu2 %916 }
 0x1b3   : > { %v648_v27 = vpop.permute.xlu1 %647 }
 0x1b4   : > { %v650_v28 = vsel %vm649_vm6, %v646_v44, %v648_v27  ;;  %v651_v29 = vsel %vm649_vm6, %v648_v27, %v646_v44  ;;  %2378 = vmatmul.msk.bf16.vlgmr.msrb.gmra.mxu0 %vm496_vm2, %v2377_v21  ;;  %2379 = vmatmul.msk.bf16.vlgmr.msrb.gmra.mxu1 %vm496_vm2, %v2377_v21  ;;  %v810_v44 = vperm.slane %v2383_v40, 0  ;;  %v2388_v40 = vld [vmem:[%s3183_s7 + $0x18] sm:$0xf]  ;;  %vm1962_vm6 = vcmp.lt.s32.totalorder %v2707_v42, 23 }
 0x1b5   : > { %v659_v30 = vmul.f32 %v655_v19, %v651_v29  ;;  %v660_v31 = vmul.f32 %v656_v20, %v650_v28  ;;  %2368 = vmatmul.msk.bf16.vlgmr.msrb.gmra.mxu2 %vm496_vm2, %v2367_v26  ;;  %2369 = vmatmul.msk.bf16.vlgmr.msrb.gmra.mxu3 %vm496_vm2, %v2367_v26  ;;  %v2373_v19 = vld [vmem:[%s3183_s7 + $0x8] sm:$0xf] }
 0x1b6   : > { %626 = vmatpush.bf16.msra.mxu2 %v614_v22  ;;  %639 = vmatpush.bf16.msra.mxu3 %v617_v25  ;;  %v2395_v22 = vld [vmem:[%s3178_s2 + $0x10] sm:$0x3] }
 0x1b7   : > { %v663_v33 = vpack.c.bf16 %v659_v30, %v659_v30  ;;  %v664_v35 = vpack.c.bf16 %v660_v31, %v660_v31  ;;  %v981_v26 = vperm.slane %v2395_v22, 0  ;;  %v982_v27 = vperm.slane %v2395_v22, 1  ;;  %v2392_v30 = vld [vmem:[%s3183_s7 + $0x1c] sm:$0xf] }
 0x1b9   : > { %v669_v36 = vsel %vm500_vm1, %v663_v33, 0  ;;  %v672_v37 = vsel %vm500_vm1, %v664_v35, 0 }
 0x1ba   : > { %681 = vmatpush.bf16.msrb.mxu2 %v669_v36  ;;  %694 = vmatpush.bf16.msrb.mxu3 %v672_v37  ;;  %v974_v25 = vpop.permute.xlu0 %973  ;;  %v2380_v36 = vld [vmem:[%s3183_s7 + $0x10] sm:$0xf] }
 0x1bb   : > { %v858_v39 = vpop.permute.xlu1 %857  ;;  %v976_v28 = vsel %vm975_vm10, %v2756_v43, %v974_v25  ;;  %v977_v29 = vsel %vm975_vm10, %v974_v25, %v2756_v43  ;;  %vm2076_vm10 = vcmp.lt.s32.totalorder %v2707_v42, 9 }
 0x1bc   : > { %v862_v61 = vsel %vm861_vm8, %v858_v39, %v860_v32  ;;  %v863_v1 = vsel %vm861_vm8, %v860_v32, %v858_v39  ;;  %v985_v31 = vmul.f32 %v981_v26, %v976_v28  ;;  %v986_v32 = vmul.f32 %v982_v27, %v977_v29 }
 0x1bd   : > { %v871_v5 = vmul.f32 %v867_v58, %v862_v61  ;;  %v872_v8 = vmul.f32 %v868_v59, %v863_v1  ;;  %vm1905_vm8 = vcmp.lt.s32.totalorder %v2707_v42, 121 }
 0x1be   : > { %v989_v33 = vpack.c.bf16 %v985_v31, %v985_v31  ;;  %v990_v35 = vpack.c.bf16 %v986_v32, %v986_v32 }
 0x1bf   : > { %v875_v13 = vpack.c.bf16 %v871_v5, %v871_v5  ;;  %v876_v14 = vpack.c.bf16 %v872_v8, %v872_v8 }
 0x1c0   : > { %v995_v37 = vsel %vm500_vm1, %v989_v33, 0  ;;  %v998_v39 = vsel %vm500_vm1, %v990_v35, 0 }
 0x1c1   : > { %v881_v20 = vsel %vm500_vm1, %v875_v13, 0  ;;  %v884_v21 = vsel %vm500_vm1, %v876_v14, 0 }
 0x1c2   : > { %v1032_v32 = vpop.permute.xlu0 %1031 }
 0x1c3   : > { %v803_v49 = vpop.permute.xlu1 %802 }
 0x1c4   : > { %v805_v50 = vsel %vm804_vm7, %v801_v48, %v803_v49  ;;  %v806_v51 = vsel %vm804_vm7, %v803_v49, %v801_v48  ;;  %vm1807_vm7 = vcmp.lt.s32.totalorder %v2707_v42, 7 }
 0x1c5   : > { %v814_v52 = vmul.f32 %v810_v44, %v805_v50  ;;  %v815_v53 = vmul.f32 %v811_v45, %v806_v51  ;;  %2370 = vmatmul.msk.bf16.vlgmr.msra.gmra.mxu2 %vm496_vm2, %v552_v47  ;;  %2371 = vmatmul.msk.bf16.vlgmr.msra.gmra.mxu3 %vm496_vm2, %v552_v47 }
 0x1c6   : > { %779 = vmatpush.bf16.msra.mxu2 %v767_v38  ;;  %792 = vmatpush.bf16.msra.mxu3 %v770_v54 }
 0x1c7   : > { %v818_v56 = vpack.c.bf16 %v814_v52, %v814_v52  ;;  %v819_v57 = vpack.c.bf16 %v815_v53, %v815_v53 }
 0x1c9   : > { %v824_v62 = vsel %vm500_vm1, %v818_v56, 0  ;;  %v827_v63 = vsel %vm500_vm1, %v819_v57, 0 }
 0x1ca   : > { %836 = vmatpush.bf16.msra.mxu0 %v824_v62  ;;  %849 = vmatpush.bf16.msra.mxu1 %v827_v63 }
 0x1cb   : > { %v915_v4 = vpop.permute.xlu1 %914 }
 0x1cc   : > { %v919_v6 = vsel %vm918_vm9, %v915_v4, %v917_v3  ;;  %v920_v7 = vsel %vm918_vm9, %v917_v3, %v915_v4 }
 0x1cd   : > { %v928_v9 = vmul.f32 %v924_v60, %v919_v6  ;;  %v929_v10 = vmul.f32 %v925_v0, %v920_v7  ;;  %2385 = vmatmul.msk.bf16.vlgmr.msra.gmra.mxu0 %vm496_vm2, %v2384_v2  ;;  %2386 = vmatmul.msk.bf16.vlgmr.msra.gmra.mxu1 %vm496_vm2, %v2384_v2 }
 0x1cf   : > { %v932_v11 = vpack.c.bf16 %v928_v9, %v928_v9  ;;  %v933_v12 = vpack.c.bf16 %v929_v10, %v929_v10 }
 0x1d1   : > { %v938_v15 = vsel %vm500_vm1, %v932_v11, 0  ;;  %v941_v18 = vsel %vm500_vm1, %v933_v12, 0  ;;  %v2400_v11 = vld [vmem:[%s3182_s6 + $0x8] sm:$0xff] }
 0x1d2   : > { %950 = vmatpush.bf16.msrb.mxu0 %v938_v15  ;;  %963 = vmatpush.bf16.msrb.mxu1 %v941_v18 }
 0x1d3   : > { %1046 = vperm.xlu1 %2535, %v2400_v11  }
 0x1d5   : > { %2374 = vmatmul.msk.bf16.vlgmr.msrb.gmra.mxu2 %vm496_vm2, %v2373_v19  ;;  %2375 = vmatmul.msk.bf16.vlgmr.msrb.gmra.mxu3 %vm496_vm2, %v2373_v19 }
 0x1d6   : > { %893 = vmatpush.bf16.msrb.mxu2 %v881_v20  ;;  %906 = vmatpush.bf16.msrb.mxu3 %v884_v21 }
 0x1dd   : > { %2393 = vmatmul.msk.bf16.vlgmr.msrb.gmra.mxu0 %vm496_vm2, %v2392_v30  ;;  %2394 = vmatmul.msk.bf16.vlgmr.msrb.gmra.mxu1 %vm496_vm2, %v2392_v30 }
 0x1e5   : > { %2381 = vmatmul.msk.bf16.vlgmr.msra.gmra.mxu2 %vm496_vm2, %v2380_v36  ;;  %2382 = vmatmul.msk.bf16.vlgmr.msra.gmra.mxu3 %vm496_vm2, %v2380_v36 }
 0x1e6   : > { %1007 = vmatpush.bf16.msra.mxu2 %v995_v37  ;;  %1020 = vmatpush.bf16.msra.mxu3 %v998_v39 }
 0x1f5   : > { %2389 = vmatmul.msk.bf16.vlgmr.msrb.gmra.mxu2 %vm496_vm2, %v2388_v40  ;;  %2390 = vmatmul.msk.bf16.vlgmr.msrb.gmra.mxu3 %vm496_vm2, %v2388_v40 }
 0x205   : > { %2397 = vmatmul.msk.bf16.vlgmr.msra.gmra.mxu2 %vm496_vm2, %v2396_v41  ;;  %2398 = vmatmul.msk.bf16.vlgmr.msra.gmra.mxu3 %vm496_vm2, %v2396_v41 }
 0x231   : > { %v740_v45 = vpop.f32.mrf.mxu0  ;;  %v753_v46 = vpop.f32.mrf.mxu1 }
 0x238   : > { %v593_v43 = vpop.f32.mrf.mxu2  ;;  %v606_v44 = vpop.f32.mrf.mxu3 }
 0x239   : > { %v742_v49 = vpop.f32.mrf.mxu0  ;;  %v755_v50 = vpop.f32.mrf.mxu1 }
 0x240   : > { %v595_v47 = vpop.f32.mrf.mxu2  ;;  %v608_v48 = vpop.f32.mrf.mxu3 }
 0x245   : > { %v1047_v47 = vpop.permute.xlu1 %1046 }
 0x248   : > { %v628_v51 = vpop.f32.mrf.mxu2  ;;  %v641_v34 = vpop.f32.mrf.mxu3 }
 0x249   : > { %v629_v57 = vadd.f32 %v628_v51, %v593_v43  ;;  %v642_v58 = vadd.f32 %v641_v34, %v606_v44 }
 0x24a   : > { %v838_v52 = vpop.f32.mrf.mxu0  ;;  %v851_v53 = vpop.f32.mrf.mxu1 }
 0x250   : > { %v630_v38 = vpop.f32.mrf.mxu2  ;;  %v643_v54 = vpop.f32.mrf.mxu3 }
 0x251   : > { %v2440_v54 = vld [vmem:[%s3182_s6 + $0x10] sm:$0xff] }
 0x252   : > { %v840_v55 = vpop.f32.mrf.mxu0  ;;  %v853_v56 = vpop.f32.mrf.mxu1 }
 0x253   : > { %v2438_v55 = vld [vmem:[%s3184_s8 + $0x8] sm:$0xff] }
 0x258   : > { %v683_v59 = vpop.f32.mrf.mxu2  ;;  %v696_v60 = vpop.f32.mrf.mxu3 }
 0x259   : > { %v700_v61 = vadd.f32 %v683_v59, %v629_v57  ;;  %v701_v62 = vadd.f32 %v696_v60, %v642_v58  ;;  %v2411_v58 = vld [vmem:[%s3178_s2 + $0x16] sm:$0x3]  ;;  %v2405_v59 = vld [vmem:[%s3178_s2 + $0x14] sm:$0x3] }
 0x25a   : > { %v952_v63 = vpop.f32.mrf.mxu0  ;;  %v965_v2 = vpop.f32.mrf.mxu1  ;;  %v1205_v60 = vperm.slane %v2411_v58, 0 }
 0x25b   : > { %v757_v0 = vadd.f32 %v740_v45, %v700_v61  ;;  %v758_v1 = vadd.f32 %v753_v46, %v701_v62  ;;  %v2399_v46 = vld [vmem:[%s3181_s5 + $0x4] sm:$0xf]  ;;  %v1206_v61 = vperm.slane %v2411_v58, 1  ;;  %v1115_v62 = vperm.slane %v2405_v59, 0 }
 0x260   : > { %v685_v3 = vpop.f32.mrf.mxu2  ;;  %v698_v4 = vpop.f32.mrf.mxu3 }
 0x262   : > { %v954_v5 = vpop.f32.mrf.mxu0  ;;  %v967_v6 = vpop.f32.mrf.mxu1 }
 0x268   : > { %v781_v7 = vpop.f32.mrf.mxu2  ;;  %v794_v8 = vpop.f32.mrf.mxu3 }
 0x269   : > { %v798_v14 = vadd.f32 %v781_v7, %v757_v0  ;;  %v799_v15 = vadd.f32 %v794_v8, %v758_v1 }
 0x26b   : > { %v855_v20 = vadd.f32 %v838_v52, %v798_v14  ;;  %v856_v21 = vadd.f32 %v851_v53, %v799_v15 }
 0x270   : > { %v783_v9 = vpop.f32.mrf.mxu2  ;;  %v796_v10 = vpop.f32.mrf.mxu3 }
 0x278   : > { %v895_v12 = vpop.f32.mrf.mxu2  ;;  %v908_v13 = vpop.f32.mrf.mxu3 }
 0x279   : > { %v912_v22 = vadd.f32 %v895_v12, %v855_v20  ;;  %v913_v25 = vadd.f32 %v908_v13, %v856_v21  ;;  %v2403_v13 = vld [vmem:[%s3178_s2 + $0x12] sm:$0x3] }
 0x27b   : > { %v969_v26 = vadd.f32 %v952_v63, %v912_v22  ;;  %v970_v27 = vadd.f32 %v965_v2, %v913_v25  ;;  %v1116_v63 = vperm.slane %v2405_v59, 1 }
 0x280   : > { %v897_v18 = vpop.f32.mrf.mxu2  ;;  %v910_v19 = vpop.f32.mrf.mxu3 }
 0x288   : > { %v1009_v28 = vpop.f32.mrf.mxu2  ;;  %v1022_v29 = vpop.f32.mrf.mxu3 }
 0x289   : > { %v1026_v30 = vadd.f32 %v1009_v28, %v969_v26  ;;  %v1027_v31 = vadd.f32 %v1022_v29, %v970_v27  ;;  %v1096_v26 = vperm.slane %v2403_v13, 0  ;;  %v1097_v27 = vperm.slane %v2403_v13, 1  ;;  %v2406_v29 = vld [vmem:[%s3183_s7 + $0x28] sm:$0xf] }
 0x28b   : > { %v1034_v33 = vadd.f32 %v1032_v32, %v1026_v30  ;;  %v1035_v35 = vadd.f32 %v1032_v32, %v1027_v31 }
 0x28d   : > { %v2827_v36 = vmax.f32 %v1034_v33, 0.0  ;;  %v2829_v37 = vmax.f32 %v1035_v35, 0.0 }
 0x28f   : > { %v1040_v39 = vpack.c.bf16 %v2827_v36, %v2827_v36  ;;  %v1041_v40 = vpack.c.bf16 %v2829_v37, %v2829_v37 }
 0x290   : > { %v1024_v41 = vpop.f32.mrf.mxu3  ;;  %v1011_v43 = vpop.f32.mrf.mxu2 }
 0x291   : > { %v1053_v44 = vsel %vm500_vm1, %v1040_v39, 0  ;;  %v1056_v45 = vsel %vm500_vm1, %v1041_v40, 0  ;;  %v2426_v41 = vld [vmem:[%s3178_s2 + $0x1e] sm:$0x3] }
 0x292   : > { %1065 = vmatpush.bf16.msra.mxu0 %v1053_v44  ;;  %1078 = vmatpush.bf16.msra.mxu1 %v1056_v45  ;;  %v2415_v44 = vld [vmem:[%s3178_s2 + $0x18] sm:$0x3] }
 0x295   : > { %2401 = vmatmul.msk.bf16.vlgmr.msra.gmra.mxu0 %vm496_vm2, %v2399_v46  ;;  %2402 = vmatmul.msk.bf16.vlgmr.msra.gmra.mxu1 %vm496_vm2, %v2399_v46 }
 0x312   : > { %v1067_v48 = vpop.f32.mrf.mxu0  ;;  %v1080_v49 = vpop.f32.mrf.mxu1 }
 0x313   : > { %v1068_v50 = vadd.f32 %v1067_v48, %v1047_v47  ;;  %v1081_v51 = vadd.f32 %v1080_v49, %v1047_v47  ;;  %v1417_v47 = vperm.slane %v2426_v41, 0  ;;  %v1418_v48 = vperm.slane %v2426_v41, 1 }
 0x315   : > { %v2842_v34 = vmax.f32 %v1068_v50, 0.0  ;;  %v2844_v52 = vmax.f32 %v1081_v51, 0.0  ;;  %v1262_v51 = vperm.slane %v2415_v44, 0 }
 0x317   : > { %1195 = vrot.lane.b32.xlu1 %v2842_v34, %s2554_s19  ;;  %1106 = vrot.lane.b32.xlu2 %v2842_v34, %s2553_s23  ;;  %v1311_v18 = vpack.c.bf16 %v2842_v34, %v2842_v34  ;;  %v1312_v21 = vpack.c.bf16 %v2844_v52, %v2844_v52 }
 0x318   : > { %1108 = vrot.lane.b32.xlu0 %v2844_v52, %s2553_s23  ;;  %s2559_s23 = smov 43  }
 0x319   : > { %v1317_v39 = vsel %vm500_vm1, %v1311_v18, 0  ;;  %v1320_v40 = vsel %vm500_vm1, %v1312_v21, 0 }
 0x31a   : > { %v1082_v53 = vpop.f32.mrf.mxu1  ;;  %v1069_v38 = vpop.f32.mrf.mxu0 }
 0x31b   : > { %v2404_v53 = vld [vmem:[%s3183_s7 + $0x24] sm:$0xf] }
 0x31f   : > { %1088 = vrot.lane.b32.xlu1 %v2844_v52, %s2555_s20  ;;  %1197 = vrot.lane.b32.xlu2 %v2844_v52, %s2554_s19  ;;  %s2562_s19 = smov 119  }
 0x320   : > { %1086 = vrot.lane.b32.xlu0 %v2842_v34, %s2555_s20  ;;  %s2563_s20 = smov 23  }
 0x327   : > { %1407 = vrot.lane.b32.xlu1 %v2842_v34, %s2556_s21  ;;  %1252 = vrot.lane.b32.xlu2 %v2842_v34, %s2557_s22 }
 0x328   : > { %1254 = vrot.lane.b32.xlu0 %v2844_v52, %s2557_s22  ;;  %s2565_s22 = smov 121  }
 0x32f   : > { %1352 = vrot.lane.b32.xlu1 %v2844_v52, %s2558_s25  ;;  %1409 = vrot.lane.b32.xlu2 %v2844_v52, %s2556_s21  ;;  %s2564_s21 = smov 7  }
 0x330   : > { %1350 = vrot.lane.b32.xlu0 %v2842_v34, %s2558_s25  ;;  %s2566_s25 = smov 16  }
 0x337   : > { %1464 = vrot.lane.b32.xlu1 %v2842_v34, %s2548_s14  ;;  %1520 = vrot.lane.b32.xlu2 %v2842_v34, %s2559_s23  ;;  %v1263_v34 = vperm.slane %v2415_v44, 1 }
 0x338   : > { %1522 = vrot.lane.b32.xlu0 %v2844_v52, %s2559_s23  ;;  %s2567_s23 = smov 9  }
 0x33f   : > { %1596 = vperm.xlu1 %2535, %v2440_v54   ;;  %1466 = vrot.lane.b32.xlu2 %v2844_v52, %s2548_s14  ;;  %s2560_s14 = smov 105  }
 0x340   : > { %1581 = vperm.xlu0 %2534, %v2438_v55  }
 0x371   : > { %v1107_v56 = vpop.permute.xlu2 %1106 }
 0x379   : > { %v1198_v57 = vpop.permute.xlu2 %1197 }
 0x381   : > { %v1253_v4 = vpop.permute.xlu2 %1252 }
 0x389   : > { %v1196_v0 = vpop.permute.xlu1 %1195  ;;  %v1410_v43 = vpop.permute.xlu2 %1409 }
 0x38a   : > { %v1200_v1 = vsel %vm1199_vm11, %v1196_v0, %v1198_v57  ;;  %v1201_v2 = vsel %vm1199_vm11, %v1198_v57, %v1196_v0  ;;  %v1109_v3 = vpop.permute.xlu0 %1108 }
 0x38b   : > { %v1209_v5 = vmul.f32 %v1205_v60, %v1201_v2  ;;  %v1210_v6 = vmul.f32 %v1206_v61, %v1200_v1  ;;  %v1110_v7 = vsel %vm918_vm9, %v1107_v56, %v1109_v3  ;;  %v1111_v8 = vsel %vm918_vm9, %v1109_v3, %v1107_v56 }
 0x38c   : > { %v1119_v9 = vmul.f32 %v1115_v62, %v1111_v8  ;;  %v1120_v10 = vmul.f32 %v1116_v63, %v1110_v7  ;;  %v2422_v62 = vld [vmem:[%s3178_s2 + $0x1c] sm:$0x3]  ;;  %vm2019_vm9 = vcmp.lt.s32.totalorder %v2707_v42, 16 }
 0x38d   : > { %v1213_v11 = vpack.c.bf16 %v1209_v5, %v1209_v5  ;;  %v1214_v12 = vpack.c.bf16 %v1210_v6, %v1210_v6  ;;  %v1360_v2 = vperm.slane %v2422_v62, 0  ;;  %v1361_v3 = vperm.slane %v2422_v62, 1 }
 0x38e   : > { %v1123_v14 = vpack.c.bf16 %v1119_v9, %v1119_v9  ;;  %v1124_v15 = vpack.c.bf16 %v1120_v10, %v1120_v10  ;;  %v2412_v9 = vld [vmem:[%s3183_s7 + $0x2c] sm:$0xf] }
 0x38f   : > { %v1219_v19 = vsel %vm500_vm1, %v1213_v11, 0  ;;  %v1222_v20 = vsel %vm500_vm1, %v1214_v12, 0 }
 0x390   : > { %v1129_v22 = vsel %vm500_vm1, %v1123_v14, 0  ;;  %v1132_v25 = vsel %vm500_vm1, %v1124_v15, 0 }
 0x391   : > { %1141 = vmatpush.bf16.msrb.mxu2 %v1129_v22  ;;  %1154 = vmatpush.bf16.msrb.mxu3 %v1132_v25  ;;  %v1089_v28 = vpop.permute.xlu1 %1088  ;;  %v1521_v1 = vpop.permute.xlu2 %1520 }
 0x392   : > { %v1087_v30 = vpop.permute.xlu0 %1086 }
 0x393   : > { %v1091_v31 = vsel %vm1090_vm12, %v1087_v30, %v1089_v28  ;;  %v1092_v32 = vsel %vm1090_vm12, %v1089_v28, %v1087_v30 }
 0x394   : > { %v1100_v33 = vmul.f32 %v1096_v26, %v1092_v32  ;;  %v1101_v35 = vmul.f32 %v1097_v27, %v1091_v31  ;;  %2407 = vmatmul.msk.bf16.vlgmr.msrb.gmra.mxu2 %vm496_vm2, %v2406_v29  ;;  %2408 = vmatmul.msk.bf16.vlgmr.msrb.gmra.mxu3 %vm496_vm2, %v2406_v29 }
 0x395   : > { %1231 = vmatpush.bf16.msra.mxu2 %v1219_v19  ;;  %1244 = vmatpush.bf16.msra.mxu3 %v1222_v20  ;;  %v2430_v19 = vld [vmem:[%s3178_s2 + $0x20] sm:$0x3]  ;;  %v2434_v20 = vld [vmem:[%s3178_s2 + $0x22] sm:$0x3] }
 0x396   : > { %v1104_v45 = vpack.c.bf16 %v1100_v33, %v1100_v33  ;;  %v1105_v46 = vpack.c.bf16 %v1101_v35, %v1101_v35  ;;  %v1473_v25 = vperm.slane %v2430_v19, 0  ;;  %v1474_v26 = vperm.slane %v2430_v19, 1  ;;  %v2416_v33 = vld [vmem:[%s3183_s7 + $0x30] sm:$0xf] }
 0x397   : > { %v1530_v29 = vperm.slane %v2434_v20, 0  ;;  %v1531_v30 = vperm.slane %v2434_v20, 1 }
 0x398   : > { %v1164_v49 = vsel %vm500_vm1, %v1104_v45, 0  ;;  %v1167_v50 = vsel %vm500_vm1, %v1105_v46, 0 }
 0x399   : > { %1329 = vmatpush.bf16.msrb.mxu2 %v1317_v39  ;;  %1342 = vmatpush.bf16.msrb.mxu3 %v1320_v40  ;;  %v1408_v52 = vpop.permute.xlu1 %1407  ;;  %v1467_v31 = vpop.permute.xlu2 %1466 }
 0x39a   : > { %1176 = vmatpush.bf16.msrb.mxu0 %v1164_v49  ;;  %1189 = vmatpush.bf16.msrb.mxu1 %v1167_v50  ;;  %v1412_v38 = vsel %vm1411_vm13, %v1408_v52, %v1410_v43  ;;  %v1413_v54 = vsel %vm1411_vm13, %v1410_v43, %v1408_v52  ;;  %v1255_v55 = vpop.permute.xlu0 %1254 }
 0x39b   : > { %v1421_v56 = vmul.f32 %v1417_v47, %v1412_v38  ;;  %v1257_v57 = vsel %vm1256_vm14, %v1253_v4, %v1255_v55  ;;  %v1258_v58 = vsel %vm1256_vm14, %v1255_v55, %v1253_v4  ;;  %v1422_v59 = vmul.f32 %v1418_v48, %v1413_v54  ;;  %v2423_v55 = vld [vmem:[%s3183_s7 + $0x38] sm:$0xf] }
 0x39c   : > { %v1266_v60 = vmul.f32 %v1262_v51, %v1258_v58  ;;  %v1267_v61 = vmul.f32 %v1263_v34, %v1257_v57  ;;  %v2431_v57 = vld [vmem:[%s3183_s7 + $0x40] sm:$0xf]  ;;  %v2435_v58 = vld [vmem:[%s3183_s7 + $0x44] sm:$0xf] }
 0x39d   : > { %2409 = vmatmul.msk.bf16.vlgmr.msrb.gmra.mxu0 %vm496_vm2, %v2404_v53  ;;  %2410 = vmatmul.msk.bf16.vlgmr.msrb.gmra.mxu1 %vm496_vm2, %v2404_v53  ;;  %v1425_v5 = vpack.c.bf16 %v1421_v56, %v1421_v56  ;;  %v1426_v4 = vpack.c.bf16 %v1422_v59, %v1422_v59  ;;  %v2419_v53 = vld [vmem:[%s3183_s7 + $0x34] sm:$0xf]  ;;  %v2427_v56 = vld [vmem:[%s3183_s7 + $0x3c] sm:$0xf] }
 0x39e   : > { %v1270_v63 = vpack.c.bf16 %v1266_v60, %v1266_v60  ;;  %v1271_v0 = vpack.c.bf16 %v1267_v61, %v1267_v61 }
 0x39f   : > { %v1431_v15 = vsel %vm500_vm1, %v1425_v5, 0  ;;  %v1434_v18 = vsel %vm500_vm1, %v1426_v4, 0 }
 0x3a0   : > { %v1276_v6 = vsel %vm500_vm1, %v1270_v63, 0  ;;  %v1279_v7 = vsel %vm500_vm1, %v1271_v0, 0 }
 0x3a1   : > { %1288 = vmatpush.bf16.msra.mxu0 %v1276_v6  ;;  %1301 = vmatpush.bf16.msra.mxu1 %v1279_v7  ;;  %v1353_v8 = vpop.permute.xlu1 %1352 }
 0x3a2   : > { %v1351_v10 = vpop.permute.xlu0 %1350 }
 0x3a3   : > { %v1355_v11 = vsel %vm1354_vm15, %v1351_v10, %v1353_v8  ;;  %v1356_v12 = vsel %vm1354_vm15, %v1353_v8, %v1351_v10 }
 0x3a4   : > { %v1364_v13 = vmul.f32 %v1360_v2, %v1355_v11  ;;  %v1365_v14 = vmul.f32 %v1361_v3, %v1356_v12  ;;  %2413 = vmatmul.msk.bf16.vlgmr.msra.gmra.mxu2 %vm496_vm2, %v2412_v9  ;;  %2414 = vmatmul.msk.bf16.vlgmr.msra.gmra.mxu3 %vm496_vm2, %v2412_v9 }
 0x3a5   : > { %1443 = vmatpush.bf16.msra.mxu2 %v1431_v15  ;;  %1456 = vmatpush.bf16.msra.mxu3 %v1434_v18 }
 0x3a6   : > { %v1368_v21 = vpack.c.bf16 %v1364_v13, %v1364_v13  ;;  %v1369_v22 = vpack.c.bf16 %v1365_v14, %v1365_v14 }
 0x3a8   : > { %v1374_v27 = vsel %vm500_vm1, %v1368_v21, 0  ;;  %v1377_v28 = vsel %vm500_vm1, %v1369_v22, 0 }
 0x3a9   : > { %1386 = vmatpush.bf16.msrb.mxu0 %v1374_v27  ;;  %1399 = vmatpush.bf16.msrb.mxu1 %v1377_v28  ;;  %v1465_v32 = vpop.permute.xlu1 %1464 }
 0x3aa   : > { %v1468_v35 = vsel %vm559_vm5, %v1465_v32, %v1467_v31  ;;  %v1469_v39 = vsel %vm559_vm5, %v1467_v31, %v1465_v32  ;;  %v1523_v40 = vpop.permute.xlu0 %1522  ;;  %vm1640_vm5 = vcmp.lt.s32.totalorder %v2707_v42, 119  ;;  %v2459_v42 = vld [vmem:[%s3183_s7 + $0x58] sm:$0xf] }
 0x3ab   : > { %v1477_v41 = vmul.f32 %v1473_v25, %v1468_v35  ;;  %v1478_v43 = vmul.f32 %v1474_v26, %v1469_v39  ;;  %v1525_v44 = vsel %vm1524_vm0, %v1521_v1, %v1523_v40  ;;  %v1526_v45 = vsel %vm1524_vm0, %v1523_v40, %v1521_v1 }
 0x3ac   : > { %v1534_v46 = vmul.f32 %v1530_v29, %v1525_v44  ;;  %v1535_v47 = vmul.f32 %v1531_v30, %v1526_v45 }
 0x3ad   : > { %2417 = vmatmul.msk.bf16.vlgmr.msra.gmra.mxu0 %vm496_vm2, %v2416_v33  ;;  %2418 = vmatmul.msk.bf16.vlgmr.msra.gmra.mxu1 %vm496_vm2, %v2416_v33  ;;  %v1481_v48 = vpack.c.bf16 %v1477_v41, %v1477_v41  ;;  %v1482_v49 = vpack.c.bf16 %v1478_v43, %v1478_v43 }
 0x3ae   : > { %v1538_v34 = vpack.c.bf16 %v1534_v46, %v1534_v46  ;;  %v1539_v52 = vpack.c.bf16 %v1535_v47, %v1535_v47 }
 0x3af   : > { %v1487_v50 = vsel %vm500_vm1, %v1481_v48, 0  ;;  %v1490_v51 = vsel %vm500_vm1, %v1482_v49, 0 }
 0x3b0   : > { %1499 = vmatpush.bf16.msra.mxu0 %v1487_v50  ;;  %1512 = vmatpush.bf16.msra.mxu1 %v1490_v51  ;;  %v1544_v38 = vsel %vm500_vm1, %v1538_v34, 0  ;;  %v1547_v54 = vsel %vm500_vm1, %v1539_v52, 0 }
 0x3b4   : > { %2420 = vmatmul.msk.bf16.vlgmr.msrb.gmra.mxu2 %vm496_vm2, %v2419_v53  ;;  %2421 = vmatmul.msk.bf16.vlgmr.msrb.gmra.mxu3 %vm496_vm2, %v2419_v53  ;;  %v1582_v53 = vpop.permute.xlu0 %1581 }
 0x3b5   : > { %1556 = vmatpush.bf16.msrb.mxu2 %v1544_v38  ;;  %1569 = vmatpush.bf16.msrb.mxu3 %v1547_v54 }
 0x3bd   : > { %2424 = vmatmul.msk.bf16.vlgmr.msrb.gmra.mxu0 %vm496_vm2, %v2423_v55  ;;  %2425 = vmatmul.msk.bf16.vlgmr.msrb.gmra.mxu1 %vm496_vm2, %v2423_v55 }
 0x3c4   : > { %2428 = vmatmul.msk.bf16.vlgmr.msra.gmra.mxu2 %vm496_vm2, %v2427_v56  ;;  %2429 = vmatmul.msk.bf16.vlgmr.msra.gmra.mxu3 %vm496_vm2, %v2427_v56 }
 0x3cd   : > { %2432 = vmatmul.msk.bf16.vlgmr.msra.gmra.mxu0 %vm496_vm2, %v2431_v57  ;;  %2433 = vmatmul.msk.bf16.vlgmr.msra.gmra.mxu1 %vm496_vm2, %v2431_v57 }
 0x3d4   : > { %2436 = vmatmul.msk.bf16.vlgmr.msrb.gmra.mxu2 %vm496_vm2, %v2435_v58  ;;  %2437 = vmatmul.msk.bf16.vlgmr.msrb.gmra.mxu3 %vm496_vm2, %v2435_v58 }
 0x417   : > { %v1143_v59 = vpop.f32.mrf.mxu2  ;;  %v1156_v60 = vpop.f32.mrf.mxu3 }
 0x41a   : > { %v1178_v61 = vpop.f32.mrf.mxu0  ;;  %v1191_v62 = vpop.f32.mrf.mxu1 }
 0x41b   : > { %v1179_v21 = vadd.f32 %v1178_v61, %v1143_v59  ;;  %v1192_v22 = vadd.f32 %v1191_v62, %v1156_v60 }
 0x41f   : > { %v1145_v63 = vpop.f32.mrf.mxu2  ;;  %v1158_v0 = vpop.f32.mrf.mxu3 }
 0x420   : > { %v2439_v63 = vld [vmem:[%s3181_s5 + $0x8] sm:$0xf]  ;;  %v1597_v0 = vpop.permute.xlu1 %1596 }
 0x422   : > { %v1180_v1 = vpop.f32.mrf.mxu0  ;;  %v1193_v2 = vpop.f32.mrf.mxu1 }
 0x427   : > { %v1233_v3 = vpop.f32.mrf.mxu2  ;;  %v1246_v5 = vpop.f32.mrf.mxu3 }
 0x428   : > { %v1250_v25 = vadd.f32 %v1233_v3, %v1179_v21  ;;  %v1251_v26 = vadd.f32 %v1246_v5, %v1192_v22 }
 0x42a   : > { %v1290_v4 = vpop.f32.mrf.mxu0  ;;  %v1303_v6 = vpop.f32.mrf.mxu1 }
 0x42b   : > { %v1307_v31 = vadd.f32 %v1290_v4, %v1250_v25  ;;  %v1308_v32 = vadd.f32 %v1303_v6, %v1251_v26 }
 0x42f   : > { %v1235_v7 = vpop.f32.mrf.mxu2  ;;  %v1248_v8 = vpop.f32.mrf.mxu3 }
 0x432   : > { %v1292_v9 = vpop.f32.mrf.mxu0  ;;  %v1305_v10 = vpop.f32.mrf.mxu1 }
 0x433   : > { %v2478_v9 = vld [vmem:[%s3184_s8 + $0x10] sm:$0xff]  ;;  %v414_v10 = vld [vmem:[%s3180_s4] sm:$0xff] }
 0x437   : > { %v1331_v11 = vpop.f32.mrf.mxu2  ;;  %v1344_v12 = vpop.f32.mrf.mxu3 }
 0x438   : > { %v1348_v33 = vadd.f32 %v1331_v11, %v1307_v31  ;;  %v1349_v35 = vadd.f32 %v1344_v12, %v1308_v32  ;;  %v2155_v11 = vld [vmem:[%s3186_s10 + $0x10] sm:$0xff]  ;;  %v2154_v12 = vld [vmem:[%s3186_s10 + $0x8] sm:$0xff] }
 0x43a   : > { %v1388_v13 = vpop.f32.mrf.mxu0  ;;  %v1401_v14 = vpop.f32.mrf.mxu1 }
 0x43b   : > { %v1405_v41 = vadd.f32 %v1388_v13, %v1348_v33  ;;  %v1406_v43 = vadd.f32 %v1401_v14, %v1349_v35 }
 0x43f   : > { %v1333_v15 = vpop.f32.mrf.mxu2  ;;  %v1346_v18 = vpop.f32.mrf.mxu3 }
 0x440   : > { %v2451_v15 = vld [vmem:[%s3178_s2 + $0x28] sm:$0x3]  ;;  %v2445_v18 = vld [vmem:[%s3178_s2 + $0x26] sm:$0x3] }
 0x441   : > { %v1666_v21 = vperm.slane %v2445_v18, 0  ;;  %v1667_v22 = vperm.slane %v2445_v18, 1 }
 0x442   : > { %v1390_v19 = vpop.f32.mrf.mxu0  ;;  %v1403_v20 = vpop.f32.mrf.mxu1 }
 0x443   : > { %v1756_v19 = vperm.slane %v2451_v15, 0  ;;  %v1757_v20 = vperm.slane %v2451_v15, 1 }
 0x447   : > { %v1445_v27 = vpop.f32.mrf.mxu2  ;;  %v1458_v28 = vpop.f32.mrf.mxu3 }
 0x448   : > { %v1462_v46 = vadd.f32 %v1445_v27, %v1405_v41  ;;  %v1463_v47 = vadd.f32 %v1458_v28, %v1406_v43  ;;  %v2443_v43 = vld [vmem:[%s3178_s2 + $0x24] sm:$0x3] }
 0x44a   : > { %v1501_v29 = vpop.f32.mrf.mxu0  ;;  %v1514_v30 = vpop.f32.mrf.mxu1 }
 0x44b   : > { %v1518_v48 = vadd.f32 %v1501_v29, %v1462_v46  ;;  %v1519_v49 = vadd.f32 %v1514_v30, %v1463_v47 }
 0x44f   : > { %v1447_v39 = vpop.f32.mrf.mxu2  ;;  %v1460_v40 = vpop.f32.mrf.mxu3 }
 0x452   : > { %v1516_v44 = vpop.f32.mrf.mxu1  ;;  %v1503_v45 = vpop.f32.mrf.mxu0 }
 0x457   : > { %v1558_v50 = vpop.f32.mrf.mxu2  ;;  %v1571_v51 = vpop.f32.mrf.mxu3 }
 0x458   : > { %v1575_v34 = vadd.f32 %v1558_v50, %v1518_v48  ;;  %v1576_v52 = vadd.f32 %v1571_v51, %v1519_v49 }
 0x45a   : > { %v1584_v38 = vadd.f32 %v1582_v53, %v1575_v34  ;;  %v1585_v54 = vadd.f32 %v1582_v53, %v1576_v52  ;;  %v1646_v34 = vperm.slane %v2443_v43, 0  ;;  %v1647_v52 = vperm.slane %v2443_v43, 1 }
 0x45c   : > { %v2981_v55 = vmax.f32 %v1584_v38, 0.0  ;;  %v2983_v56 = vmax.f32 %v1585_v54, 0.0  ;;  %v2446_v38 = vld [vmem:[%s3183_s7 + $0x4c] sm:$0xf] }
 0x45e   : > { %v1590_v57 = vpack.c.bf16 %v2981_v55, %v2981_v55  ;;  %v1591_v58 = vpack.c.bf16 %v2983_v56, %v2983_v56 }
 0x45f   : > { %v1573_v59 = vpop.f32.mrf.mxu3  ;;  %v1560_v60 = vpop.f32.mrf.mxu2 }
 0x460   : > { %v1603_v61 = vsel %vm500_vm1, %v1590_v57, 0  ;;  %v1606_v62 = vsel %vm500_vm1, %v1591_v58, 0 }
 0x461   : > { %1615 = vmatpush.bf16.msrb.mxu0 %v1603_v61  ;;  %1628 = vmatpush.bf16.msrb.mxu1 %v1606_v62 }
 0x464   : > { %2441 = vmatmul.msk.bf16.vlgmr.msrb.gmra.mxu0 %vm496_vm2, %v2439_v63  ;;  %2442 = vmatmul.msk.bf16.vlgmr.msrb.gmra.mxu1 %vm496_vm2, %v2439_v63  ;;  %v2466_v63 = vld [vmem:[%s3178_s2 + $0x30] sm:$0x3] }
 0x4e1   : > { %v1617_v1 = vpop.f32.mrf.mxu0  ;;  %v1630_v2 = vpop.f32.mrf.mxu1 }
 0x4e2   : > { %v1618_v3 = vadd.f32 %v1617_v1, %v1597_v0  ;;  %v1631_v5 = vadd.f32 %v1630_v2, %v1597_v0  ;;  %v2455_v1 = vld [vmem:[%s3178_s2 + $0x2a] sm:$0x3] }
 0x4e4   : > { %v2996_v4 = vmax.f32 %v1618_v3, 0.0  ;;  %v2998_v6 = vmax.f32 %v1631_v5, 0.0  ;;  %v1968_v5 = vperm.slane %v2466_v63, 0 }
 0x4e6   : > { %1746 = vrot.lane.b32.xlu1 %v2996_v4, %s2560_s14  ;;  %1656 = vrot.lane.b32.xlu2 %v2996_v4, %s2561_s16  ;;  %v1862_v46 = vpack.c.bf16 %v2996_v4, %v2996_v4  ;;  %v1863_v49 = vpack.c.bf16 %v2998_v6, %v2998_v6 }
 0x4e7   : > { %1658 = vrot.lane.b32.xlu0 %v2998_v6, %s2561_s16  ;;  %s3160_s16 = scalar_lea.vmem %s3187_s11, %s2495_s13 }
 0x4e8   : > { %v1868_v61 = vsel %vm500_vm1, %v1862_v46, 0  ;;  %v1871_v62 = vsel %vm500_vm1, %v1863_v49, 0  ;;  %v2470_v49 = vld [vmem:[%s3178_s2 + $0x32] sm:$0x3] }
 0x4e9   : > { %v1632_v7 = vpop.f32.mrf.mxu1  ;;  %v1619_v8 = vpop.f32.mrf.mxu0 }
 0x4ea   : > { %v1813_v8 = vperm.slane %v2455_v1, 0 }
 0x4ee   : > { %1638 = vrot.lane.b32.xlu1 %v2998_v6, %s2562_s19  ;;  %1748 = vrot.lane.b32.xlu2 %v2998_v6, %s2560_s14 }
 0x4ef   : > { %1636 = vrot.lane.b32.xlu0 %v2996_v4, %s2562_s19 }
 0x4f6   : > { %1958 = vrot.lane.b32.xlu1 %v2996_v4, %s2563_s20  ;;  %1803 = vrot.lane.b32.xlu2 %v2996_v4, %s2564_s21 }
 0x4f7   : > { %1805 = vrot.lane.b32.xlu0 %v2998_v6, %s2564_s21 }
 0x4fe   : > { %1903 = vrot.lane.b32.xlu1 %v2998_v6, %s2565_s22  ;;  %1960 = vrot.lane.b32.xlu2 %v2998_v6, %s2563_s20 }
 0x4ff   : > { %1901 = vrot.lane.b32.xlu0 %v2996_v4, %s2565_s22 }
 0x506   : > { %2015 = vrot.lane.b32.xlu1 %v2996_v4, %s2566_s25  ;;  %2072 = vrot.lane.b32.xlu2 %v2996_v4, %s2567_s23  ;;  %v1969_v4 = vperm.slane %v2466_v63, 1 }
 0x507   : > { %2074 = vrot.lane.b32.xlu0 %v2998_v6, %s2567_s23 }
 0x50e   : > { %2133 = vperm.xlu1 %2535, %v2478_v9   ;;  %2017 = vrot.lane.b32.xlu2 %v2998_v6, %s2566_s25  ;;  %v1814_v9 = vperm.slane %v2455_v1, 1 }
 0x50f   : > { %418 = vperm.xlu0 %2534, %v414_v10  }
 0x516   : > { %2169 = vperm.xlu1 %2535, %v2155_v11   ;;  %v2444_v11 = vld [vmem:[%s3183_s7 + $0x48] sm:$0xf] }
 0x517   : > { %2164 = vperm.xlu0 %2534, %v2154_v12  }
 0x540   : > { %v1657_v13 = vpop.permute.xlu2 %1656 }
 0x548   : > { %v1749_v14 = vpop.permute.xlu2 %1748 }
 0x550   : > { %v1804_v29 = vpop.permute.xlu2 %1803 }
 0x558   : > { %v1747_v25 = vpop.permute.xlu1 %1746  ;;  %v1961_v0 = vpop.permute.xlu2 %1960 }
 0x559   : > { %v1751_v26 = vsel %vm1750_vm3, %v1747_v25, %v1749_v14  ;;  %v1752_v27 = vsel %vm1750_vm3, %v1749_v14, %v1747_v25  ;;  %v1659_v28 = vpop.permute.xlu0 %1658  ;;  %v2462_v25 = vld [vmem:[%s3178_s2 + $0x2e] sm:$0x3] }
 0x55a   : > { %v1760_v30 = vmul.f32 %v1756_v19, %v1752_v27  ;;  %v1761_v31 = vmul.f32 %v1757_v20, %v1751_v26  ;;  %v1661_v32 = vsel %vm1660_vm4, %v1657_v13, %v1659_v28  ;;  %v1662_v33 = vsel %vm1660_vm4, %v1659_v28, %v1657_v13 }
 0x55b   : > { %v1670_v35 = vmul.f32 %v1666_v21, %v1662_v33  ;;  %v1671_v39 = vmul.f32 %v1667_v22, %v1661_v32 }
 0x55c   : > { %v1764_v40 = vpack.c.bf16 %v1760_v30, %v1760_v30  ;;  %v1765_v41 = vpack.c.bf16 %v1761_v31, %v1761_v31  ;;  %v1911_v30 = vperm.slane %v2462_v25, 0  ;;  %v1912_v31 = vperm.slane %v2462_v25, 1 }
 0x55d   : > { %v1674_v44 = vpack.c.bf16 %v1670_v35, %v1670_v35  ;;  %v1675_v45 = vpack.c.bf16 %v1671_v39, %v1671_v39 }
 0x55e   : > { %v1770_v47 = vsel %vm500_vm1, %v1764_v40, 0  ;;  %v1773_v48 = vsel %vm500_vm1, %v1765_v41, 0  ;;  %v2452_v40 = vld [vmem:[%s3183_s7 + $0x50] sm:$0xf] }
 0x55f   : > { %v1680_v50 = vsel %vm500_vm1, %v1674_v44, 0  ;;  %v1683_v51 = vsel %vm500_vm1, %v1675_v45, 0 }
 0x560   : > { %1692 = vmatpush.bf16.msra.mxu2 %v1680_v50  ;;  %1705 = vmatpush.bf16.msra.mxu3 %v1683_v51  ;;  %v1639_v53 = vpop.permute.xlu1 %1638  ;;  %v2073_v28 = vpop.permute.xlu2 %2072  ;;  %v2474_v50 = vld [vmem:[%s3178_s2 + $0x34] sm:$0x3] }
 0x561   : > { %v1637_v54 = vpop.permute.xlu0 %1636 }
 0x562   : > { %v1641_v57 = vsel %vm1640_vm5, %v1637_v54, %v1639_v53  ;;  %v1642_v58 = vsel %vm1640_vm5, %v1639_v53, %v1637_v54  ;;  %v2026_v53 = vperm.slane %v2470_v49, 1 }
 0x563   : > { %v1650_v59 = vmul.f32 %v1646_v34, %v1642_v58  ;;  %v1651_v60 = vmul.f32 %v1647_v52, %v1641_v57  ;;  %2447 = vmatmul.msk.bf16.vlgmr.msra.gmra.mxu2 %vm496_vm2, %v2446_v38  ;;  %2448 = vmatmul.msk.bf16.vlgmr.msra.gmra.mxu3 %vm496_vm2, %v2446_v38  ;;  %v2025_v52 = vperm.slane %v2470_v49, 0  ;;  %v2082_v57 = vperm.slane %v2474_v50, 0 }
 0x564   : > { %1782 = vmatpush.bf16.msrb.mxu2 %v1770_v47  ;;  %1795 = vmatpush.bf16.msrb.mxu3 %v1773_v48  ;;  %v2083_v58 = vperm.slane %v2474_v50, 1 }
 0x565   : > { %v1654_v2 = vpack.c.bf16 %v1650_v59, %v1650_v59  ;;  %v1655_v3 = vpack.c.bf16 %v1651_v60, %v1651_v60 }
 0x567   : > { %v1715_v6 = vsel %vm500_vm1, %v1654_v2, 0  ;;  %v1718_v7 = vsel %vm500_vm1, %v1655_v3, 0 }
 0x568   : > { %1880 = vmatpush.bf16.msra.mxu2 %v1868_v61  ;;  %1893 = vmatpush.bf16.msra.mxu3 %v1871_v62  ;;  %v1959_v10 = vpop.permute.xlu1 %1958  ;;  %v2018_v59 = vpop.permute.xlu2 %2017  ;;  %v2456_v61 = vld [vmem:[%s3183_s7 + $0x54] sm:$0xf] }
 0x569   : > { %1727 = vmatpush.bf16.msra.mxu0 %v1715_v6  ;;  %1740 = vmatpush.bf16.msra.mxu1 %v1718_v7  ;;  %v1963_v12 = vsel %vm1962_vm6, %v1959_v10, %v1961_v0  ;;  %v1964_v13 = vsel %vm1962_vm6, %v1961_v0, %v1959_v10  ;;  %v1806_v14 = vpop.permute.xlu0 %1805 }
 0x56a   : > { %v1972_v15 = vmul.f32 %v1968_v5, %v1963_v12  ;;  %v1808_v18 = vsel %vm1807_vm7, %v1804_v29, %v1806_v14  ;;  %v1809_v19 = vsel %vm1807_vm7, %v1806_v14, %v1804_v29  ;;  %v1973_v20 = vmul.f32 %v1969_v4, %v1964_v13 }
 0x56b   : > { %v1817_v21 = vmul.f32 %v1813_v8, %v1809_v19  ;;  %v1818_v22 = vmul.f32 %v1814_v9, %v1808_v18  ;;  %v2140_v18 = vld [vmem:[%s401_s29] sm:$0xff] }
 0x56c   : > { %2449 = vmatmul.msk.bf16.vlgmr.msra.gmra.mxu0 %vm496_vm2, %v2444_v11  ;;  %2450 = vmatmul.msk.bf16.vlgmr.msra.gmra.mxu1 %vm496_vm2, %v2444_v11  ;;  %v1976_v32 = vpack.c.bf16 %v1972_v15, %v1972_v15  ;;  %v1977_v29 = vpack.c.bf16 %v1973_v20, %v1973_v20 }
 0x56d   : > { %v1821_v26 = vpack.c.bf16 %v1817_v21, %v1817_v21  ;;  %v1822_v27 = vpack.c.bf16 %v1818_v22, %v1818_v22  ;;  %v2141_v21 = vunpack.c.l.bf16 %v2140_v18  ;;  %v2142_v22 = vunpack.c.h.bf16 %v2140_v18 }
 0x56e   : > { %v1982_v47 = vsel %vm500_vm1, %v1976_v32, 0  ;;  %v1985_v48 = vsel %vm500_vm1, %v1977_v29, 0 }
 0x56f   : > { %v1827_v33 = vsel %vm500_vm1, %v1821_v26, 0  ;;  %v1830_v35 = vsel %vm500_vm1, %v1822_v27, 0 }
 0x570   : > { %1839 = vmatpush.bf16.msrb.mxu0 %v1827_v33  ;;  %1852 = vmatpush.bf16.msrb.mxu1 %v1830_v35  ;;  %v1904_v39 = vpop.permute.xlu1 %1903 }
 0x571   : > { %v1902_v41 = vpop.permute.xlu0 %1901 }
 0x572   : > { %v1906_v43 = vsel %vm1905_vm8, %v1902_v41, %v1904_v39  ;;  %v1907_v44 = vsel %vm1905_vm8, %v1904_v39, %v1902_v41 }
 0x573   : > { %v1915_v45 = vmul.f32 %v1911_v30, %v1906_v43  ;;  %v1916_v46 = vmul.f32 %v1912_v31, %v1907_v44  ;;  %2453 = vmatmul.msk.bf16.vlgmr.msrb.gmra.mxu2 %vm496_vm2, %v2452_v40  ;;  %2454 = vmatmul.msk.bf16.vlgmr.msrb.gmra.mxu3 %vm496_vm2, %v2452_v40  ;;  %v2471_v30 = vld [vmem:[%s3183_s7 + $0x64] sm:$0xf]  ;;  %v2475_v31 = vld [vmem:[%s3183_s7 + $0x68] sm:$0xf] }
 0x574   : > { %1994 = vmatpush.bf16.msrb.mxu2 %v1982_v47  ;;  %2007 = vmatpush.bf16.msrb.mxu3 %v1985_v48 }
 0x575   : > { %v1919_v51 = vpack.c.bf16 %v1915_v45, %v1915_v45  ;;  %v1920_v34 = vpack.c.bf16 %v1916_v46, %v1916_v46 }
 0x577   : > { %v1925_v38 = vsel %vm500_vm1, %v1919_v51, 0  ;;  %v1928_v54 = vsel %vm500_vm1, %v1920_v34, 0 }
 0x578   : > { %1937 = vmatpush.bf16.msra.mxu0 %v1925_v38  ;;  %1950 = vmatpush.bf16.msra.mxu1 %v1928_v54  ;;  %v2016_v60 = vpop.permute.xlu1 %2015 }
 0x579   : > { %v2020_v62 = vsel %vm2019_vm9, %v2016_v60, %v2018_v59  ;;  %v2021_v63 = vsel %vm2019_vm9, %v2018_v59, %v2016_v60  ;;  %v2075_v0 = vpop.permute.xlu0 %2074 }
 0x57a   : > { %v2029_v1 = vmul.f32 %v2025_v52, %v2020_v62  ;;  %v2030_v2 = vmul.f32 %v2026_v53, %v2021_v63  ;;  %v2077_v3 = vsel %vm2076_vm10, %v2073_v28, %v2075_v0  ;;  %v2078_v5 = vsel %vm2076_vm10, %v2075_v0, %v2073_v28  ;;  %v2467_v28 = vld [vmem:[%s3183_s7 + $0x60] sm:$0xf] }
 0x57b   : > { %v2086_v4 = vmul.f32 %v2082_v57, %v2077_v3  ;;  %v2087_v6 = vmul.f32 %v2083_v58, %v2078_v5 }
 0x57c   : > { %2457 = vmatmul.msk.bf16.vlgmr.msrb.gmra.mxu0 %vm496_vm2, %v2456_v61  ;;  %2458 = vmatmul.msk.bf16.vlgmr.msrb.gmra.mxu1 %vm496_vm2, %v2456_v61  ;;  %v2033_v7 = vpack.c.bf16 %v2029_v1, %v2029_v1  ;;  %v2034_v8 = vpack.c.bf16 %v2030_v2, %v2030_v2 }
 0x57d   : > { %v2090_v11 = vpack.c.bf16 %v2086_v4, %v2086_v4  ;;  %v2091_v12 = vpack.c.bf16 %v2087_v6, %v2087_v6 }
 0x57e   : > { %v2039_v9 = vsel %vm500_vm1, %v2033_v7, 0  ;;  %v2042_v10 = vsel %vm500_vm1, %v2034_v8, 0 }
 0x57f   : > { %2051 = vmatpush.bf16.msrb.mxu0 %v2039_v9  ;;  %2064 = vmatpush.bf16.msrb.mxu1 %v2042_v10  ;;  %v2096_v19 = vsel %vm500_vm1, %v2090_v11, 0  ;;  %v2099_v20 = vsel %vm500_vm1, %v2091_v12, 0  ;;  %vm2187_vm1 = vcmask 392192  }
 0x581   : > { %v419_v13 = vpop.permute.xlu0 %418 }
 0x582   : > { %v465_v14 = vadd.f32 %v2661_v16, %v419_v13  ;;  %v479_v15 = vadd.f32 %v2663_v17, %v419_v13  ;;  %v2463_v16 = vld [vmem:[%s3183_s7 + $0x5c] sm:$0xf] }
 0x583   : > { %2460 = vmatmul.msk.bf16.vlgmr.msra.gmra.mxu2 %vm496_vm2, %v2459_v42  ;;  %2461 = vmatmul.msk.bf16.vlgmr.msra.gmra.mxu3 %vm496_vm2, %v2459_v42 }
 0x584   : > { %2108 = vmatpush.bf16.msra.mxu2 %v2096_v19  ;;  %2121 = vmatpush.bf16.msra.mxu3 %v2099_v20  ;;  %v483_v25 = vmax.f32 %v465_v14, 0.0  ;;  %v484_v26 = vmax.f32 %v479_v15, 0.0 }
 0x586   : > { %v2151_v17 = vpack.c.bf16 %v2141_v21, %v483_v25  ;;  %v2152_v27 = vpack.c.bf16 %v2142_v22, %v484_v26  ;;  %v2153_v21 = vld [vmem:[%s3186_s10] sm:$0xff]  ;;  %v2134_v26 = vpop.permute.xlu1 %2133 }
 0x587   : > { %2159 = vperm.xlu2 %2536, %v2153_v21  }
 0x58c   : > { %2464 = vmatmul.msk.bf16.vlgmr.msra.gmra.mxu0 %vm496_vm2, %v2463_v16  ;;  %2465 = vmatmul.msk.bf16.vlgmr.msra.gmra.mxu1 %vm496_vm2, %v2463_v16 }
 0x58d   : > { %2199 = vmatpush.bf16.msra.mxu0 %v2151_v17  ;;  %2218 = vmatpush.bf16.msra.mxu1 %v2152_v27 }
 0x593   : > { %2468 = vmatmul.msk.bf16.vlgmr.msrb.gmra.mxu2 %vm496_vm2, %v2467_v28  ;;  %2469 = vmatmul.msk.bf16.vlgmr.msrb.gmra.mxu3 %vm496_vm2, %v2467_v28 }
 0x59c   : > { %2472 = vmatmul.msk.bf16.vlgmr.msrb.gmra.mxu0 %vm496_vm2, %v2471_v30  ;;  %2473 = vmatmul.msk.bf16.vlgmr.msrb.gmra.mxu1 %vm496_vm2, %v2471_v30 }
 0x5a3   : > { %2476 = vmatmul.msk.bf16.vlgmr.msra.gmra.mxu2 %vm496_vm2, %v2475_v31  ;;  %2477 = vmatmul.msk.bf16.vlgmr.msra.gmra.mxu3 %vm496_vm2, %v2475_v31 }
 0x5e6   : > { %v1694_v32 = vpop.f32.mrf.mxu2  ;;  %v1707_v29 = vpop.f32.mrf.mxu3 }
 0x5e9   : > { %v1729_v33 = vpop.f32.mrf.mxu0  ;;  %v1742_v35 = vpop.f32.mrf.mxu1 }
 0x5ea   : > { %v1730_v60 = vadd.f32 %v1729_v33, %v1694_v32  ;;  %v1743_v61 = vadd.f32 %v1742_v35, %v1707_v29  ;;  %v2156_v32 = vld [vmem:[%s3186_s10 + $0x18] sm:$0xff]  ;;  %v2147_v35 = vpack.c.bf16 %v2827_v36, %v2665_v23  ;;  %v408_v23 = vld [vmem:[%s2645_s24] sm:$0xff]  ;;  %v2160_v36 = vpop.permute.xlu2 %2159 }
 0x5eb   : > { %2174 = vperm.xlu2 %2536, %v2156_v32  }
 0x5ee   : > { %v1696_v39 = vpop.f32.mrf.mxu2  ;;  %v1709_v40 = vpop.f32.mrf.mxu3 }
 0x5ef   : > { %v2148_v39 = vpack.c.bf16 %v2829_v37, %v2667_v24  ;;  %v2232_v24 = vunpack.c.l.bf16 %v408_v23  ;;  %v2233_v37 = vunpack.c.h.bf16 %v408_v23 }
 0x5f1   : > { %v1731_v41 = vpop.f32.mrf.mxu0  ;;  %v1744_v43 = vpop.f32.mrf.mxu1 }
 0x5f6   : > { %v1784_v44 = vpop.f32.mrf.mxu2  ;;  %v1797_v45 = vpop.f32.mrf.mxu3 }
 0x5f7   : > { %v1801_v62 = vadd.f32 %v1784_v44, %v1730_v60  ;;  %v1802_v63 = vadd.f32 %v1797_v45, %v1743_v61 }
 0x5f9   : > { %v1841_v46 = vpop.f32.mrf.mxu0  ;;  %v1854_v47 = vpop.f32.mrf.mxu1 }
 0x5fa   : > { %v1858_v5 = vadd.f32 %v1841_v46, %v1801_v62  ;;  %v1859_v4 = vadd.f32 %v1854_v47, %v1802_v63  ;;  %v409_v47 = vld [vmem:[%s2645_s24 + $0x8] sm:$0xff]  ;;  %v2170_v62 = vpop.permute.xlu1 %2169 }
 0x5fe   : > { %v1786_v48 = vpop.f32.mrf.mxu2  ;;  %v1799_v49 = vpop.f32.mrf.mxu3 }
 0x601   : > { %v1843_v50 = vpop.f32.mrf.mxu0  ;;  %v1856_v51 = vpop.f32.mrf.mxu1 }
 0x602   : > { %v2165_v50 = vpop.permute.xlu0 %2164  ;;  %v2234_v51 = vunpack.c.l.bf16 %v409_v47 }
 0x606   : > { %v1882_v34 = vpop.f32.mrf.mxu2  ;;  %v1895_v52 = vpop.f32.mrf.mxu3 }
 0x607   : > { %v1899_v6 = vadd.f32 %v1882_v34, %v1858_v5  ;;  %v1900_v7 = vadd.f32 %v1895_v52, %v1859_v4  ;;  %v2235_v34 = vunpack.c.h.bf16 %v409_v47 }
 0x609   : > { %v1939_v53 = vpop.f32.mrf.mxu0  ;;  %v1952_v38 = vpop.f32.mrf.mxu1 }
 0x60a   : > { %v1956_v10 = vadd.f32 %v1939_v53, %v1899_v6  ;;  %v1957_v11 = vadd.f32 %v1952_v38, %v1900_v7  ;;  %v411_v7 = vld [vmem:[%s2645_s24 + $0x18] sm:$0xff] }
 0x60e   : > { %v1884_v54 = vpop.f32.mrf.mxu2  ;;  %v1897_v57 = vpop.f32.mrf.mxu3 }
 0x611   : > { %v1941_v58 = vpop.f32.mrf.mxu0  ;;  %v1954_v59 = vpop.f32.mrf.mxu1 }
 0x612   : > { %v410_v59 = vld [vmem:[%s2645_s24 + $0x10] sm:$0xff] }
 0x613   : > { %v2236_v63 = vunpack.c.l.bf16 %v410_v59 }
 0x616   : > { %v1996_v0 = vpop.f32.mrf.mxu2  ;;  %v2009_v1 = vpop.f32.mrf.mxu3 }
 0x617   : > { %v2013_v13 = vadd.f32 %v1996_v0, %v1956_v10  ;;  %v2014_v14 = vadd.f32 %v2009_v1, %v1957_v11  ;;  %v2237_v0 = vunpack.c.h.bf16 %v410_v59  ;;  %v2238_v11 = vunpack.c.l.bf16 %v411_v7 }
 0x619   : > { %v2053_v2 = vpop.f32.mrf.mxu0  ;;  %v2066_v3 = vpop.f32.mrf.mxu1 }
 0x61a   : > { %v2070_v15 = vadd.f32 %v2053_v2, %v2013_v13  ;;  %v2071_v18 = vadd.f32 %v2066_v3, %v2014_v14 }
 0x61e   : > { %v1998_v8 = vpop.f32.mrf.mxu2  ;;  %v2011_v9 = vpop.f32.mrf.mxu3 }
 0x621   : > { %v2055_v12 = vpop.f32.mrf.mxu0  ;;  %v2068_v42 = vpop.f32.mrf.mxu1 }
 0x622   : > { %v2239_v12 = vunpack.c.h.bf16 %v411_v7 }
 0x626   : > { %v2110_v19 = vpop.f32.mrf.mxu2  ;;  %v2123_v20 = vpop.f32.mrf.mxu3 }
 0x627   : > { %v2127_v22 = vadd.f32 %v2110_v19, %v2070_v15  ;;  %v2128_v25 = vadd.f32 %v2123_v20, %v2071_v18 }
 0x629   : > { %v2136_v16 = vadd.f32 %v2134_v26, %v2127_v22  ;;  %v2137_v17 = vadd.f32 %v2134_v26, %v2128_v25 }
 0x62b   : > { %v2138_v27 = vmax.f32 %v2136_v16, 0.0  ;;  %v2139_v28 = vmax.f32 %v2137_v17, 0.0 }
 0x62d   : > { %v2149_v30 = vpack.c.bf16 %v2138_v27, %v2981_v55  ;;  %v2150_v31 = vpack.c.bf16 %v2139_v28, %v2983_v56  ;;  %v2501_v55 = vld [vmem:[%s3185_s9] sm:$0xff]  ;;  %v2502_v56 = vld [vmem:[%s3185_s9 + $0x8] sm:$0xff] }
 0x62e   : > { %v2112_v29 = vpop.f32.mrf.mxu2  ;;  %v2125_v33 = vpop.f32.mrf.mxu3 }
 0x62f   : > { %2200 = vmatpush.bf16.msra.mxu0 %v2149_v30  ;;  %2219 = vmatpush.bf16.msra.mxu1 %v2150_v31 }
 0x633   : > { %2201 = vmatpush.bf16.msra.mxu0 %v2147_v35  ;;  %2220 = vmatpush.bf16.msra.mxu1 %v2148_v39 }
 0x636   : > { %2487 = vmatmul.msk.bf16.vlgmr.msra.gmra.mxu0 %vm2187_vm1, %v2501_v55  ;;  %2489 = vmatmul.msk.bf16.vlgmr.msra.gmra.mxu1 %vm2187_vm1, %v2501_v55 }
 0x645   : > { %v2175_v10 = vpop.permute.xlu2 %2174 }
 0x646   : > { %2488 = vmatmul.msk.bf16.gmra.mxu0 %vm2187_vm1, %v2502_v56  ;;  %2490 = vmatmul.msk.bf16.gmra.mxu1 %vm2187_vm1, %v2502_v56 }
 0x6b3   : > { %v2203_v40 = vpop.f32.mrf.mxu0  ;;  %v2222_v41 = vpop.f32.mrf.mxu1 }
 0x6b4   : > { %v2204_v43 = vadd.f32 %v2203_v40, %v2160_v36  ;;  %v2223_v44 = vadd.f32 %v2222_v41, %v2160_v36 }
 0x6b6   : > { %v2240_v45 = vadd.f32 %v2232_v24, %v2204_v43  ;;  %v2241_v46 = vadd.f32 %v2233_v37, %v2223_v44 }
 0x6b8   : > { %v2248_v48 = vmax.f32 %v2240_v45, 0.0  ;;  %v2249_v49 = vmax.f32 %v2241_v46, 0.0 }
 0x6ba   : > { %2256 = vst [vmem:[%s3160_s16] sm:$0xff] %v2248_v48 }
 0x6bb   : > { %v2205_v52 = vpop.f32.mrf.mxu0  ;;  %v2224_v53 = vpop.f32.mrf.mxu1  ;;  %2257 = vst [vmem:[%s3160_s16 + $0x8] sm:$0xff] %v2249_v49 }
 0x6bc   : > { %v2206_v38 = vadd.f32 %v2205_v52, %v2165_v50  ;;  %v2225_v54 = vadd.f32 %v2224_v53, %v2165_v50 }
 0x6be   : > { %v2242_v57 = vadd.f32 %v2234_v51, %v2206_v38  ;;  %v2243_v58 = vadd.f32 %v2235_v34, %v2225_v54 }
 0x6c0   : > { %v2250_v60 = vmax.f32 %v2242_v57, 0.0  ;;  %v2251_v61 = vmax.f32 %v2243_v58, 0.0 }
 0x6c2   : > { %2258 = vst [vmem:[%s3160_s16 + $0x10] sm:$0xff] %v2250_v60 }
 0x6c3   : > { %2259 = vst [vmem:[%s3160_s16 + $0x18] sm:$0xff] %v2251_v61  ;;  %v2208_v1 = vpop.f32.mrf.mxu0  ;;  %v2227_v2 = vpop.f32.mrf.mxu1 }
 0x6c4   : > { %v2209_v3 = vadd.f32 %v2208_v1, %v2170_v62  ;;  %v2228_v5 = vadd.f32 %v2227_v2, %v2170_v62 }
 0x6c6   : > { %v2244_v4 = vadd.f32 %v2236_v63, %v2209_v3  ;;  %v2245_v6 = vadd.f32 %v2237_v0, %v2228_v5 }
 0x6c8   : > { %v2252_v8 = vmax.f32 %v2244_v4, 0.0  ;;  %v2253_v9 = vmax.f32 %v2245_v6, 0.0 }
 0x6ca   : > { %2260 = vst [vmem:[%s3160_s16 + $0x20] sm:$0xff] %v2252_v8 }
 0x6cb   : > { %2261 = vst [vmem:[%s3160_s16 + $0x28] sm:$0xff] %v2253_v9  ;;  %v2210_v42 = vpop.f32.mrf.mxu0  ;;  %v2229_v13 = vpop.f32.mrf.mxu1 }
 0x6cc   : > { %v2211_v14 = vadd.f32 %v2210_v42, %v2175_v10  ;;  %v2230_v15 = vadd.f32 %v2229_v13, %v2175_v10 }
 0x6ce   : > { %v2246_v18 = vadd.f32 %v2238_v11, %v2211_v14  ;;  %v2247_v19 = vadd.f32 %v2239_v12, %v2230_v15 }
 0x6d0   : > { %v2254_v20 = vmax.f32 %v2246_v18, 0.0  ;;  %v2255_v21 = vmax.f32 %v2247_v19, 0.0 }
 0x6d2   : > { %2262 = vst [vmem:[%s3160_s16 + $0x30] sm:$0xff] %v2254_v20 }
 0x6d3   : > { %2263 = vst [vmem:[%s3160_s16 + $0x38] sm:$0xff] %v2255_v21 }
 0x6d4 PF: > { %s21_s17 = sadd.s32 1, %s2543_s17  }
 0x6d5   : > { %p18_p4 = scmp.ge.s32.totalorder %s21_s17, 4  }
 0x6d7   :  { %20 = sbr.rel (!%p18_p4) target bundleno = 1 (0x1), region = 152 }

</bundles_post_ra>
